<compile_context>
chip_gen: v7x
topology: tpu7x:2x2x1
jax: 0.10.0
libtpu: 0.0.40
codegen_flags: <defaults>
</compile_context>

<pallas_src>
import jax
import jax.numpy as jnp
from jax.experimental import pallas as pl
from jax.experimental.pallas import tpu as pltpu

INPUT_SIZE = 1 * 28 * 28   # 784 (contraction dim of layer 1; fed unpadded)
H1, H2, H3, H4 = 512, 256, 128, 64
H4_PAD = 128               # lane-dense output width (64 padded to 128)


def _round_up(v, m):
    return (v + m - 1) // m * m


def _select_batch_tile(B):
    """Batch tile: multiple of 16 (bf16 sublane packing); >=2 grid steps for
    mid-size batches (v7x has 2 TensorCores); 1024 rows for large batches so
    the fixed per-grid-step overhead is amortized."""
    Bp = _round_up(B, 16)
    if Bp <= 128:
        return Bp                                   # tiny batch: single tile
    if Bp <= 2048:
        return min(1024, _round_up(Bp // 2, 128))   # >=2 steps, 128-aligned
    return 1024                                     # large batch


def encoder_kernel(x_ref, w1_ref, w2_ref, w3_ref, b3_ref, w4_ref, b4_ref, o_ref):
    # Four chained MXU matmuls: bf16 operands, f32 accumulators.  The f32->bf16
    # cast of x happens here (VPU, in VMEM) so the wrapper never materializes a
    # second copy of x in HBM.  Bias adds / ReLU stay in f32 (safe on v5e's
    # non-bf16 VPU), then cast back to bf16 for the next bf16 MXU matmul.
    x = x_ref[...].astype(jnp.bfloat16)

    h = jnp.dot(x, w1_ref[...], preferred_element_type=jnp.float32)
    h = jnp.maximum(h, 0.0).astype(jnp.bfloat16)

    h = jnp.dot(h, w2_ref[...], preferred_element_type=jnp.float32)
    h = jnp.maximum(h, 0.0).astype(jnp.bfloat16)

    h = jnp.dot(h, w3_ref[...], preferred_element_type=jnp.float32) + b3_ref[...]
    h = jnp.maximum(h, 0.0).astype(jnp.bfloat16)

    h = jnp.dot(h, w4_ref[...], preferred_element_type=jnp.float32) + b4_ref[...]
    h = jnp.maximum(h, 0.0)

    o_ref[...] = h.astype(o_ref.dtype)   # bf16, lane-dense 128-wide store


def prepare_params(params):
    """One-time conversion of (in, out)-layout f32 params to kernel layout:
    bf16 weights (MXU-native), f32 biases, last-layer outputs padded 64->128
    so the kernel's epilogue store is lane-dense.  Call once, reuse."""
    w1, w2, w3, b3, w4, b4 = params
    w1p = w1.astype(jnp.bfloat16)                                        # (784, 512)
    w2p = w2.astype(jnp.bfloat16)                                        # (512, 256)
    w3p = w3.astype(jnp.bfloat16)                                        # (256, 128)
    b3p = b3.reshape(1, H3).astype(jnp.float32)                          # (1, 128)
    w4p = jnp.pad(w4, ((0, 0), (0, H4_PAD - H4))).astype(jnp.bfloat16)   # (128, 128)
    b4p = jnp.pad(b4.reshape(1, H4), ((0, 0), (0, H4_PAD - H4))).astype(jnp.float32)
    return w1p, w2p, w3p, b3p, w4p, b4p


def encoder_forward(x, prepared_params, *, batch_tile=None):
    """x: (B, 1, 28, 28) float32 -> (B, 64) float32."""
    w1p, w2p, w3p, b3p, w4p, b4p = prepared_params
    B = x.shape[0]

    # Flatten NCHW exactly like torch's x.reshape(B, 784).  No K padding and
    # no dtype cast here: the kernel reads x once from HBM in f32 and casts
    # on-chip (block last-dim 784 is legal: it equals the full array dim).
    x2d = x.reshape(B, INPUT_SIZE)

    tb = batch_tile if batch_tile is not None else _select_batch_tile(B)
    Bp = _round_up(B, tb)
    if Bp != B:
        x2d = jnp.pad(x2d, ((0, Bp - B), (0, 0)))
    grid = (Bp // tb,)

    # Weights/biases: full block, constant block index -> DMA'd once and kept
    # VMEM-resident across the batch grid (no refetch per step).
    const_spec = lambda shape: pl.BlockSpec(shape, lambda i: (0, 0))

    # Per-step VMEM footprint (with headroom), so the scoped limit is safe on
    # v7x's 64 MiB physical VMEM even with 1024-row tiles.
    w_bytes = (w1p.size + w2p.size + w3p.size + w4p.size) * 2 \
        + (b3p.size + b4p.size) * 4
    vmem_est = (
        2 * tb * INPUT_SIZE * 4            # x tile, double-buffered, f32
        + 2 * tb * H4_PAD * 2              # out tile, double-buffered, bf16
        + 2 * w_bytes                      # resident weights/biases (conservative)
        + tb * (H1 + H2 + H3 + H4_PAD) * 6  # f32 + bf16 intermediate activations
    )
    vmem_limit = max(16 << 20, min(48 << 20, int(vmem_est * 1.5)))

    flops = 2 * Bp * (INPUT_SIZE * H1 + H1 * H2 + H2 * H3 + H3 * H4_PAD)
    bytes_accessed = (
        x2d.size * 4                                             # x read (f32)
        + w_bytes                                                # weights/biases
        + Bp * H4_PAD * 2                                        # bf16 output write
    )

    out = pl.pallas_call(
        encoder_kernel,
        out_shape=jax.ShapeDtypeStruct((Bp, H4_PAD), jnp.bfloat16),
        grid_spec=pltpu.PrefetchScalarGridSpec(
            num_scalar_prefetch=0,
            grid=grid,
            in_specs=[
                pl.BlockSpec((tb, INPUT_SIZE), lambda i: (i, 0)),  # x tile (pipelined)
                const_spec((INPUT_SIZE, H1)),                      # w1 (bias=False)
                const_spec((H1, H2)),                              # w2 (bias=False)
                const_spec((H2, H3)),                              # w3
                const_spec((1, H3)),                               # b3
                const_spec((H3, H4_PAD)),                          # w4 (padded 64->128)
                const_spec((1, H4_PAD)),                           # b4 (padded 64->128)
            ],
            out_specs=pl.BlockSpec((tb, H4_PAD), lambda i: (i, 0)),
        ),
        compiler_params=pltpu.CompilerParams(
            dimension_semantics=("parallel",),
            vmem_limit_bytes=vmem_limit,
        ),
        cost_estimate=pl.CostEstimate(
            flops=flops, transcendentals=0, bytes_accessed=bytes_accessed),
    )(x2d, w1p, w2p, w3p, b3p, w4p, b4p)

    return out[:B, :H4].astype(jnp.float32)


def init_params(key):
    """Deterministic synthetic params matching nn.Linear shapes (stored as (in, out))."""
    ks = jax.random.split(key, 6)

    def uniform_init(k, fan_in, shape):
        bound = 1.0 / jnp.sqrt(fan_in)
        return jax.random.uniform(k, shape, jnp.float32, -bound, bound)

    w1 = uniform_init(ks[0], INPUT_SIZE, (INPUT_SIZE, H1))  # enc_1 (bias=False)
    w2 = uniform_init(ks[1], H1, (H1, H2))                  # new_enc3 (bias=False)
    w3 = uniform_init(ks[2], H2, (H2, H3))                  # new_enc4
    b3 = uniform_init(ks[3], H2, (1, H3))
    w4 = uniform_init(ks[4], H3, (H3, H4))                  # enc_2
    b4 = uniform_init(ks[5], H3, (1, H4))
    return w1, w2, w3, b3, w4, b4


def reference_forward(x, params):
    w1, w2, w3, b3, w4, b4 = params
    h = x.reshape(x.shape[0], INPUT_SIZE)
    h = jax.nn.relu(h @ w1)
    h = jax.nn.relu(h @ w2)
    h = jax.nn.relu(h @ w3 + b3)
    h = jax.nn.relu(h @ w4 + b4)
    return h


if __name__ == "__main__":
    key = jax.random.PRNGKey(0)
    k_x, k_p = jax.random.split(key)

    B = 8
    x = jax.random.normal(k_x, (B, 1, 28, 28), jnp.float32)
    params = init_params(k_p)
    prepared = prepare_params(params)   # one-time kernel-layout conversion

    out = encoder_forward(x, prepared)
    out = jax.block_until_ready(out)

    ref = reference_forward(x, params)
    assert out.shape == (B, 64), out.shape
    # bf16 matmul path + bf16 output store -> looser tolerance vs. f32 reference.
    max_err = float(jnp.max(jnp.abs(out - ref)))
    assert jnp.allclose(out, ref, atol=5e-2, rtol=5e-2), max_err

    print("KERNEL_OK")
</pallas_src>

<mosaic_0001>
module attributes {stable_mosaic.version = 11 : i64} {
  func.func @encoder_kernel(%arg0: i32, %arg1: memref<16x784xf32, #tpu.memory_space<vmem>>, %arg2: memref<784x512xbf16, #tpu.memory_space<vmem>>, %arg3: memref<512x256xbf16, #tpu.memory_space<vmem>>, %arg4: memref<256x128xbf16, #tpu.memory_space<vmem>>, %arg5: memref<1x128xf32, #tpu.memory_space<vmem>>, %arg6: memref<128x128xbf16, #tpu.memory_space<vmem>>, %arg7: memref<1x128xf32, #tpu.memory_space<vmem>>, %arg8: memref<16x128xbf16, #tpu.memory_space<vmem>>) attributes {dimension_semantics = [#tpu.dimension_semantics<parallel>], iteration_bounds = array<i64: 1>, scalar_prefetch = 0 : i64, scratch_operands = 0 : i64, tpu.core_type = #tpu.core_type<tc>, window_params = [{transform_indices = @transform_0, window_bounds = array<i64: 16, 784>}, {pipeline_mode = #tpu.pipeline_mode<synchronous>, transform_indices = @transform_1, window_bounds = array<i64: 784, 512>}, {pipeline_mode = #tpu.pipeline_mode<synchronous>, transform_indices = @transform_2, window_bounds = array<i64: 512, 256>}, {pipeline_mode = #tpu.pipeline_mode<synchronous>, transform_indices = @transform_3, window_bounds = array<i64: 256, 128>}, {pipeline_mode = #tpu.pipeline_mode<synchronous>, transform_indices = @transform_4, window_bounds = array<i64: 1, 128>}, {pipeline_mode = #tpu.pipeline_mode<synchronous>, transform_indices = @transform_5, window_bounds = array<i64: 128, 128>}, {pipeline_mode = #tpu.pipeline_mode<synchronous>, transform_indices = @transform_6, window_bounds = array<i64: 1, 128>}, {transform_indices = @transform_7, window_bounds = array<i64: 16, 128>}]} {
    %c0 = arith.constant 0 : index
    %c0_0 = arith.constant 0 : index
    %0 = vector.load %arg1[%c0, %c0_0] : memref<16x784xf32, #tpu.memory_space<vmem>>, vector<16x784xf32>
    %1 = arith.truncf %0 : vector<16x784xf32> to vector<16x784xbf16>
    %c0_1 = arith.constant 0 : index
    %c0_2 = arith.constant 0 : index
    %2 = vector.load %arg2[%c0_1, %c0_2] : memref<784x512xbf16, #tpu.memory_space<vmem>>, vector<784x512xbf16>
    %cst = arith.constant dense<0.000000e+00> : vector<16x512xf32>
    %3 = tpu.matmul %1, %2, %cst {dimension_numbers = #tpu.dot_dimension_numbers<[1], [0], [0], [1], [0, 0, 1, 1], [], []>} : vector<16x784xbf16>, vector<784x512xbf16>, vector<16x512xf32> -> vector<16x512xf32>
    %cst_3 = arith.constant 0.000000e+00 : f32
    %4 = vector.broadcast %cst_3 : f32 to vector<16x512xf32>
    %5 = arith.maximumf %3, %4 : vector<16x512xf32>
    %6 = arith.truncf %5 : vector<16x512xf32> to vector<16x512xbf16>
    %c0_4 = arith.constant 0 : index
    %c0_5 = arith.constant 0 : index
    %7 = vector.load %arg3[%c0_4, %c0_5] : memref<512x256xbf16, #tpu.memory_space<vmem>>, vector<512x256xbf16>
    %cst_6 = arith.constant dense<0.000000e+00> : vector<16x256xf32>
    %8 = tpu.matmul %6, %7, %cst_6 {dimension_numbers = #tpu.dot_dimension_numbers<[1], [0], [0], [1], [0, 0, 1, 1], [], []>} : vector<16x512xbf16>, vector<512x256xbf16>, vector<16x256xf32> -> vector<16x256xf32>
    %cst_7 = arith.constant 0.000000e+00 : f32
    %9 = vector.broadcast %cst_7 : f32 to vector<16x256xf32>
    %10 = arith.maximumf %8, %9 : vector<16x256xf32>
    %11 = arith.truncf %10 : vector<16x256xf32> to vector<16x256xbf16>
    %c0_8 = arith.constant 0 : index
    %c0_9 = arith.constant 0 : index
    %12 = vector.load %arg4[%c0_8, %c0_9] : memref<256x128xbf16, #tpu.memory_space<vmem>>, vector<256x128xbf16>
    %cst_10 = arith.constant dense<0.000000e+00> : vector<16x128xf32>
    %13 = tpu.matmul %11, %12, %cst_10 {dimension_numbers = #tpu.dot_dimension_numbers<[1], [0], [0], [1], [0, 0, 1, 1], [], []>} : vector<16x256xbf16>, vector<256x128xbf16>, vector<16x128xf32> -> vector<16x128xf32>
    %c0_11 = arith.constant 0 : index
    %c0_12 = arith.constant 0 : index
    %14 = vector.load %arg5[%c0_11, %c0_12] : memref<1x128xf32, #tpu.memory_space<vmem>>, vector<1x128xf32>
    %15 = vector.broadcast %14 : vector<1x128xf32> to vector<16x128xf32>
    %16 = arith.addf %13, %15 : vector<16x128xf32>
    %cst_13 = arith.constant 0.000000e+00 : f32
    %17 = vector.broadcast %cst_13 : f32 to vector<16x128xf32>
    %18 = arith.maximumf %16, %17 : vector<16x128xf32>
    %19 = arith.truncf %18 : vector<16x128xf32> to vector<16x128xbf16>
    %c0_14 = arith.constant 0 : index
    %c0_15 = arith.constant 0 : index
    %20 = vector.load %arg6[%c0_14, %c0_15] : memref<128x128xbf16, #tpu.memory_space<vmem>>, vector<128x128xbf16>
    %cst_16 = arith.constant dense<0.000000e+00> : vector<16x128xf32>
    %21 = tpu.matmul %19, %20, %cst_16 {dimension_numbers = #tpu.dot_dimension_numbers<[1], [0], [0], [1], [0, 0, 1, 1], [], []>} : vector<16x128xbf16>, vector<128x128xbf16>, vector<16x128xf32> -> vector<16x128xf32>
    %c0_17 = arith.constant 0 : index
    %c0_18 = arith.constant 0 : index
    %22 = vector.load %arg7[%c0_17, %c0_18] : memref<1x128xf32, #tpu.memory_space<vmem>>, vector<1x128xf32>
    %23 = vector.broadcast %22 : vector<1x128xf32> to vector<16x128xf32>
    %24 = arith.addf %21, %23 : vector<16x128xf32>
    %cst_19 = arith.constant 0.000000e+00 : f32
    %25 = vector.broadcast %cst_19 : f32 to vector<16x128xf32>
    %26 = arith.maximumf %24, %25 : vector<16x128xf32>
    %27 = arith.truncf %26 : vector<16x128xf32> to vector<16x128xbf16>
    %c0_20 = arith.constant 0 : index
    %c0_21 = arith.constant 0 : index
    %28 = vector.load %arg8[%c0_20, %c0_21] : memref<16x128xbf16, #tpu.memory_space<vmem>>, vector<16x128xbf16>
    tpu.vector_store %arg8[%c0_20, %c0_21], %27 {strides = array<i32>} : memref<16x128xbf16, #tpu.memory_space<vmem>>, vector<16x128xbf16>,
    return
  }
  func.func @transform_0(%arg0: i32) -> (i32, i32) {
    %c0_i32 = arith.constant 0 : i32
    %c0_i32_0 = arith.constant 0 : i32
    return %arg0, %c0_i32 : i32, i32
  }
  func.func @transform_1(%arg0: i32) -> (i32, i32) {
    %c0_i32 = arith.constant 0 : i32
    %c0_i32_0 = arith.constant 0 : i32
    %c0_i32_1 = arith.constant 0 : i32
    return %c0_i32, %c0_i32_0 : i32, i32
  }
  func.func @transform_2(%arg0: i32) -> (i32, i32) {
    %c0_i32 = arith.constant 0 : i32
    %c0_i32_0 = arith.constant 0 : i32
    %c0_i32_1 = arith.constant 0 : i32
    return %c0_i32, %c0_i32_0 : i32, i32
  }
  func.func @transform_3(%arg0: i32) -> (i32, i32) {
    %c0_i32 = arith.constant 0 : i32
    %c0_i32_0 = arith.constant 0 : i32
    %c0_i32_1 = arith.constant 0 : i32
    return %c0_i32, %c0_i32_0 : i32, i32
  }
  func.func @transform_4(%arg0: i32) -> (i32, i32) {
    %c0_i32 = arith.constant 0 : i32
    %c0_i32_0 = arith.constant 0 : i32
    %c0_i32_1 = arith.constant 0 : i32
    return %c0_i32, %c0_i32_0 : i32, i32
  }
  func.func @transform_5(%arg0: i32) -> (i32, i32) {
    %c0_i32 = arith.constant 0 : i32
    %c0_i32_0 = arith.constant 0 : i32
    %c0_i32_1 = arith.constant 0 : i32
    return %c0_i32, %c0_i32_0 : i32, i32
  }
  func.func @transform_6(%arg0: i32) -> (i32, i32) {
    %c0_i32 = arith.constant 0 : i32
    %c0_i32_0 = arith.constant 0 : i32
    %c0_i32_1 = arith.constant 0 : i32
    return %c0_i32, %c0_i32_0 : i32, i32
  }
  func.func @transform_7(%arg0: i32) -> (i32, i32) {
    %c0_i32 = arith.constant 0 : i32
    %c0_i32_0 = arith.constant 0 : i32
    return %arg0, %c0_i32 : i32, i32
  }
}

</mosaic_0001>

<bundles_post_ra>
// kernel: tpu_custom_call.1
= control target key start
LH: loop header
LB: loop body
LE: loop exit
PB: predicated region body
PF: predicated region fallthrough
CT: control target
= control target key end

     0   :  { %12 = vsyncpa [#allocation3], 0  ;;  %s3562_s0 = inlined_call_operand.hbm [shape: f32[16,784], index: 0, kind: input, shape index: {}]   ;;  %s3563_s1 = inlined_call_operand.hbm [shape: bf16[784,512], index: 1, kind: input, shape index: {}]   ;;  %s3564_s2 = inlined_call_operand.hbm [shape: bf16[512,256], index: 2, kind: input, shape index: {}]   ;;  %s3565_s3 = inlined_call_operand.hbm [shape: bf16[256,128], index: 3, kind: input, shape index: {}]   ;;  %s3566_s4 = inlined_call_operand.vmem [shape: f32[1,128], index: 4, kind: input, shape index: {}]   ;;  %s3567_s5 = inlined_call_operand.hbm [shape: bf16[128,128], index: 5, kind: input, shape index: {}]   ;;  %s3568_s6 = inlined_call_operand.vmem [shape: f32[1,128], index: 6, kind: input, shape index: {}]   ;;  %s3569_s7 = inlined_call_operand.hbm [shape: bf16[16,128], index: 7, kind: output, shape index: {}]  }
   0x1   :  { %13 = vsyncpa [#allocation6], 0 }
   0x2   :  { %14 = vsyncpa [#allocation9], 0 }
   0x3   :  { %15 = vsyncpa [#allocation4], 0  ;;  %s3398_s24 = smov [#allocation5]   ;;  %s3258_s28 = scalar_lea.hbm %s3563_s1, 25088 }
   0x4   :  { %s33_s25 = sshll.u32 %s3398_s24, 4  ;;  %p3259_p0 = scmp.ne.s32.totalorder %s3563_s1, %s3258_s28  ;;  %s34_s25 = int_to_ptr.vmem [resolvable:$true] %s33_s25 }
   0x5   :  { %p3262_p1 = scmp.lt.u32.totalorder %s3258_s28, %s3563_s1 }
   0x7   :  { %p3264_p2 = pnand %p3262_p1, %p3259_p0 }
   0x9   :  { %3267 = shalt.err (!%p3264_p2)
}
   0xa   :  { %s3268_s10 = scalar_lea.vmem %s34_s25, 25088  ;;  %p3273_p4 = scmp.lt.s32.totalorder %s34_s25, %s34_s25 }
   0xb   :  { %p3269_p3 = scmp.ne.s32.totalorder %s34_s25, %s3268_s10  ;;  %p3274_p5 = scmp.lt.s32.totalorder %s3268_s10, %s3268_s10 }
   0xd   :  { %p3275_p6 = por %p3274_p5, %p3273_p4 }
   0xf   :  { %p3276_p7 = pnand %p3275_p6, %p3269_p3 }
  0x11   :  { %3279 = shalt.err (!%p3276_p7)
}
  0x12   :  { %s3399_s11 = smov 256   ;;  %s3400_s12 = smov 16  }
  0x13   :  { %39 = dma.hbm_to_vmem [thread:$0]  %s3563_s1, 25088, %s34_s25, [#allocation6], %s3399_s11, %s3399_s11, %s3400_s12  }
  0x14   :  { %s3401_s15 = smov [#allocation8]   ;;  %s3280_s19 = scalar_lea.hbm %s3565_s3, 2048 }
  0x15   :  { %s57_s16 = sshll.u32 %s3401_s15, 4  ;;  %p3281_p8 = scmp.ne.s32.totalorder %s3565_s3, %s3280_s19  ;;  %s58_s16 = int_to_ptr.vmem [resolvable:$true] %s57_s16 }
  0x16   :  { %p3284_p9 = scmp.lt.u32.totalorder %s3280_s19, %s3565_s3 }
  0x18   :  { %p3286_p10 = pnand %p3284_p9, %p3281_p8 }
  0x1a   :  { %3289 = shalt.err (!%p3286_p10)
}
  0x1b   :  { %s3290_s24 = scalar_lea.vmem %s58_s16, 2048  ;;  %p3295_p12 = scmp.lt.s32.totalorder %s58_s16, %s58_s16 }
  0x1c   :  { %p3291_p11 = scmp.ne.s32.totalorder %s58_s16, %s3290_s24  ;;  %p3296_p13 = scmp.lt.s32.totalorder %s3290_s24, %s3290_s24 }
  0x1e   :  { %p3297_p0 = por %p3296_p13, %p3295_p12 }
  0x20   :  { %p3298_p1 = pnand %p3297_p0, %p3291_p11 }
  0x22   :  { %3301 = shalt.err (!%p3298_p1)
}
  0x23   :  { %s3402_s1 = smov 64   ;;  %s3403_s25 = smov 4  }
  0x24   :  { %63 = dma.hbm_to_vmem [thread:$0]  %s3565_s3, 2048, %s58_s16, [#allocation9], %s3402_s1, %s3402_s1, %s3403_s25  }
  0x25   :  { %s3404_s28 = smov [#allocation2]   ;;  %s3302_s9 = scalar_lea.hbm %s3562_s0, 1792 }
  0x26   :  { %s21_s29 = sshll.u32 %s3404_s28, 4  ;;  %p3303_p2 = scmp.ne.s32.totalorder %s3562_s0, %s3302_s9  ;;  %s22_s29 = int_to_ptr.vmem [resolvable:$true] %s21_s29 }
  0x27   :  { %p3306_p3 = scmp.lt.u32.totalorder %s3302_s9, %s3562_s0 }
  0x29   :  { %p3308_p4 = pnand %p3306_p3, %p3303_p2 }
  0x2b   :  { %3311 = shalt.err (!%p3308_p4)
}
  0x2c   :  { %s3312_s14 = scalar_lea.vmem %s22_s29, 1792  ;;  %p3317_p6 = scmp.lt.s32.totalorder %s22_s29, %s22_s29 }
  0x2d   :  { %p3313_p5 = scmp.ne.s32.totalorder %s22_s29, %s3312_s14  ;;  %p3318_p7 = scmp.lt.s32.totalorder %s3312_s14, %s3312_s14 }
  0x2f   :  { %p3319_p8 = por %p3318_p7, %p3317_p6 }
  0x31   :  { %p3320_p9 = pnand %p3319_p8, %p3313_p5 }
  0x33   :  { %3323 = shalt.err (!%p3320_p9)
}
  0x34   :  { %s3405_s3 = smov 896   ;;  %s3406_s15 = smov 56  }
  0x35   :  { %27 = dma.hbm_to_vmem [thread:$0]  %s3562_s0, 1792, %s22_s29, [#allocation3], %s3405_s3, %s3405_s3, %s3406_s15  }
  0x36   :  { %s3407_s18 = smov [#allocation7]   ;;  %s3324_s22 = scalar_lea.hbm %s3564_s2, 8192 }
  0x37   :  { %s45_s19 = sshll.u32 %s3407_s18, 4  ;;  %p3325_p10 = scmp.ne.s32.totalorder %s3564_s2, %s3324_s22  ;;  %s46_s19 = int_to_ptr.vmem [resolvable:$true] %s45_s19 }
  0x38   :  { %p3328_p11 = scmp.lt.u32.totalorder %s3324_s22, %s3564_s2 }
  0x3a   :  { %p3330_p12 = pnand %p3328_p11, %p3325_p10 }
  0x3c   :  { %3333 = shalt.err (!%p3330_p12)
}
  0x3d   :  { %s3334_s28 = scalar_lea.vmem %s46_s19, 8192  ;;  %p3339_p0 = scmp.lt.s32.totalorder %s46_s19, %s46_s19 }
  0x3e   :  { %p3335_p13 = scmp.ne.s32.totalorder %s46_s19, %s3334_s28  ;;  %p3340_p1 = scmp.lt.s32.totalorder %s3334_s28, %s3334_s28 }
  0x40   :  { %p3341_p2 = por %p3340_p1, %p3339_p0 }
  0x42   :  { %p3342_p3 = pnand %p3341_p2, %p3335_p13 }
  0x44   :  { %3345 = shalt.err (!%p3342_p3)
}
  0x45   :  { %s3408_s0 = smov 128   ;;  %s3409_s29 = smov 8  }
  0x46   :  { %51 = dma.hbm_to_vmem [thread:$0]  %s3564_s2, 8192, %s46_s19, [#allocation6], %s3408_s0, %s3408_s0, %s3409_s29  }
  0x47   :  { %s3410_s9 = smov [#allocation10]   ;;  %s3346_s13 = scalar_lea.hbm %s3567_s5, 1024 }
  0x48   :  { %s71_s10 = sshll.u32 %s3410_s9, 4  ;;  %p3347_p4 = scmp.ne.s32.totalorder %s3567_s5, %s3346_s13  ;;  %s72_s10 = int_to_ptr.vmem [resolvable:$true] %s71_s10 }
  0x49   :  { %p3350_p5 = scmp.lt.u32.totalorder %s3346_s13, %s3567_s5 }
  0x4b   :  { %p3352_p6 = pnand %p3350_p5, %p3347_p4 }
  0x4d   :  { %3355 = shalt.err (!%p3352_p6)
}
  0x4e   :  { %s3356_s17 = scalar_lea.vmem %s72_s10, 1024  ;;  %p3361_p8 = scmp.lt.s32.totalorder %s72_s10, %s72_s10 }
  0x4f   :  { %p3357_p7 = scmp.ne.s32.totalorder %s72_s10, %s3356_s17  ;;  %p3362_p9 = scmp.lt.s32.totalorder %s3356_s17, %s3356_s17 }
  0x51   :  { %p3363_p10 = por %p3362_p9, %p3361_p8 }
  0x53   :  { %p3364_p11 = pnand %p3363_p10, %p3357_p7 }
  0x55   :  { %3367 = shalt.err (!%p3364_p11)
}
  0x56   :  { %77 = dma.hbm_to_vmem [thread:$0]  %s3567_s5, 1024, %s72_s10, [#allocation9], %s3402_s1, %s3402_s1, %s3403_s25  }
  0x57   :  { %3390 = dma.done.wait [#allocation3], 1792  }
  0x58   :  { %3391 = vsyncadd [#allocation3], 4294965504 }
  0x59   :  { %3392 = dma.done.wait [#allocation6], 33280  }
  0x5a   :  { %3393 = vsyncadd [#allocation6], 4294934016 }
  0x5b   :  { %3394 = dma.done.wait [#allocation9], 3072  }
  0x5c   :  { %3395 = vsyncadd [#allocation9], 4294964224  ;;  %v3411_v0 = vmov 0   ;;  %v2844_v1 = vld [vmem:[#allocation5 + $0x4] ss:$16 sps:$4 sm:$0xff]   ;;  %v109_v10 = vld [vmem:[#allocation2 + $0x68] sm:$0xff] }
  0x5d   :  { %1458 = vmatprep.mubr.bf16.mxu1 %v3411_v0  ;;  %v2846_v2 = vld [vmem:[#allocation5 + $0x604] ss:$16 sps:$4 sm:$0xff]   ;;  %1297 = vmatprep.subr.bf16.mxu0 %v2844_v1  ;;  %v2848_v3 = vld [vmem:[#allocation5] ss:$16 sps:$4 sm:$0xff]   ;;  %v2852_v6 = vld [vmem:[#allocation5 + $0x8] ss:$16 sps:$4 sm:$0xff]  }
  0x5e   :  { %v2849_v4 = vld [vmem:[#allocation5 + $0x600] ss:$16 sps:$4 sm:$0xff]   ;;  %1426 = vmatprep.subr.bf16.mxu1 %v2846_v2  ;;  %v2850_v5 = vld [vmem:[#allocation5 + $0x24] ss:$16 sps:$4 sm:$0xff]   ;;  %1298 = vmatpush1.bf16.msra.mxu0 %v2848_v3  ;;  %v2854_v7 = vld [vmem:[#allocation5 + $0xc] ss:$16 sps:$4 sm:$0xff]  }
  0x5f   :  { %1427 = vmatpush1.bf16.msra.mxu1 %v2849_v4  ;;  %1299 = vmatprep.subr.bf16.mxu0 %v2850_v5  ;;  %v2855_v8 = vld [vmem:[#allocation5 + $0x20] ss:$16 sps:$4 sm:$0xff]   ;;  %vm1293_vm0 = vcmask 130048   ;;  %v2856_v12 = vld [vmem:[#allocation5 + $0x44] ss:$16 sps:$4 sm:$0xff]   ;;  %v97_v51 = vld [vmem:[#allocation2 + $0x8] sm:$0xff] }
  0x60   :  { %v102_v9 = vld [vmem:[#allocation2 + $0x30] sm:$0xff]  ;;  %1469 = vmatprep.subr.bf16.mxu1 %v2854_v7  ;;  %v2858_v13 = vld [vmem:[#allocation5 + $0x28] ss:$16 sps:$4 sm:$0xff]   ;;  %v2860_v14 = vld [vmem:[#allocation5 + $0x2c] ss:$16 sps:$4 sm:$0xff]   ;;  %vm3413_vm1 = vmmov 0  }
  0x61   :  { %v3522_v11 = vpack.c.bf16 %v109_v10, %v102_v9  ;;  %v2861_v15 = vld [vmem:[#allocation5 + $0x40] ss:$16 sps:$4 sm:$0xff]   ;;  %v2862_v16 = vld [vmem:[#allocation5 + $0x64] ss:$16 sps:$4 sm:$0xff]   ;;  %v2866_v17 = vld [vmem:[#allocation5 + $0x4c] ss:$16 sps:$4 sm:$0xff]  }
  0x62   :  { %1300 = vmatpush1.bf16.msra.mxu0 %v2855_v8  ;;  %v2867_v18 = vld [vmem:[#allocation5 + $0x60] ss:$16 sps:$4 sm:$0xff]   ;;  %v2864_v19 = vld [vmem:[#allocation5 + $0x48] ss:$16 sps:$4 sm:$0xff]   ;;  %v2868_v20 = vld [vmem:[#allocation5 + $0x84] ss:$16 sps:$4 sm:$0xff]  }
  0x63   :  { %2647 = vmatmul.mubr.msk.bf16.vlgmr.msra.gmra.mrb[0].mxu1 %vm1293_vm0, %v3522_v11  ;;  %1301 = vmatprep.subr.bf16.mxu0 %v2856_v12  ;;  %v2872_v21 = vld [vmem:[#allocation5 + $0x6c] ss:$16 sps:$4 sm:$0xff]   ;;  %v2870_v22 = vld [vmem:[#allocation5 + $0x68] ss:$16 sps:$4 sm:$0xff]   ;;  %v2873_v23 = vld [vmem:[#allocation5 + $0x80] ss:$16 sps:$4 sm:$0xff]  }
  0x64   :  { %1470 = vmatpush1.bf16.msra.mxu1 %v2852_v6  ;;  %v2874_v24 = vld [vmem:[#allocation5 + $0xa4] ss:$16 sps:$4 sm:$0xff]   ;;  %v2878_v25 = vld [vmem:[#allocation5 + $0x8c] ss:$16 sps:$4 sm:$0xff]   ;;  %v2879_v26 = vld [vmem:[#allocation5 + $0xa0] ss:$16 sps:$4 sm:$0xff]  }
  0x65   :  { %1471 = vmatprep.subr.bf16.mxu1 %v2860_v14  ;;  %v2876_v27 = vld [vmem:[#allocation5 + $0x88] ss:$16 sps:$4 sm:$0xff]   ;;  %v2880_v28 = vld [vmem:[#allocation5 + $0xc4] ss:$16 sps:$4 sm:$0xff]   ;;  %v2884_v29 = vld [vmem:[#allocation5 + $0xac] ss:$16 sps:$4 sm:$0xff]  }
  0x66   :  { %1302 = vmatpush1.bf16.msra.mxu0 %v2861_v15  ;;  %v2882_v30 = vld [vmem:[#allocation5 + $0xa8] ss:$16 sps:$4 sm:$0xff]   ;;  %v2885_v31 = vld [vmem:[#allocation5 + $0xc0] ss:$16 sps:$4 sm:$0xff]   ;;  %v2886_v32 = vld [vmem:[#allocation5 + $0xe4] ss:$16 sps:$4 sm:$0xff]  }
  0x67   :  { %1303 = vmatprep.subr.bf16.mxu0 %v2862_v16  ;;  %v2890_v33 = vld [vmem:[#allocation5 + $0xcc] ss:$16 sps:$4 sm:$0xff]   ;;  %v2891_v34 = vld [vmem:[#allocation5 + $0xe0] ss:$16 sps:$4 sm:$0xff]   ;;  %v2888_v35 = vld [vmem:[#allocation5 + $0xc8] ss:$16 sps:$4 sm:$0xff]  }
  0x68   :  { %1472 = vmatpush1.bf16.msra.mxu1 %v2858_v13  ;;  %v2892_v36 = vld [vmem:[#allocation5 + $0x104] ss:$16 sps:$4 sm:$0xff]   ;;  %v2896_v37 = vld [vmem:[#allocation5 + $0xec] ss:$16 sps:$4 sm:$0xff]   ;;  %v2894_v38 = vld [vmem:[#allocation5 + $0xe8] ss:$16 sps:$4 sm:$0xff]  }
  0x69   :  { %1473 = vmatprep.subr.bf16.mxu1 %v2866_v17  ;;  %v2897_v39 = vld [vmem:[#allocation5 + $0x100] ss:$16 sps:$4 sm:$0xff]   ;;  %v2898_v40 = vld [vmem:[#allocation5 + $0x124] ss:$16 sps:$4 sm:$0xff]   ;;  %v2902_v41 = vld [vmem:[#allocation5 + $0x10c] ss:$16 sps:$4 sm:$0xff]  }
  0x6a   :  { %1304 = vmatpush1.bf16.msra.mxu0 %v2867_v18  ;;  %v2903_v42 = vld [vmem:[#allocation5 + $0x120] ss:$16 sps:$4 sm:$0xff]   ;;  %v2900_v43 = vld [vmem:[#allocation5 + $0x108] ss:$16 sps:$4 sm:$0xff]   ;;  %v2904_v44 = vld [vmem:[#allocation5 + $0x144] ss:$16 sps:$4 sm:$0xff]  }
  0x6b   :  { %1305 = vmatprep.subr.bf16.mxu0 %v2868_v20  ;;  %v2908_v45 = vld [vmem:[#allocation5 + $0x12c] ss:$16 sps:$4 sm:$0xff]   ;;  %v2906_v46 = vld [vmem:[#allocation5 + $0x128] ss:$16 sps:$4 sm:$0xff]   ;;  %v2909_v47 = vld [vmem:[#allocation5 + $0x140] ss:$16 sps:$4 sm:$0xff]  }
  0x6c   :  { %1474 = vmatpush1.bf16.msra.mxu1 %v2864_v19  ;;  %v2910_v48 = vld [vmem:[#allocation5 + $0x164] ss:$16 sps:$4 sm:$0xff]   ;;  %v2914_v49 = vld [vmem:[#allocation5 + $0x14c] ss:$16 sps:$4 sm:$0xff]   ;;  %v2912_v50 = vld [vmem:[#allocation5 + $0x148] ss:$16 sps:$4 sm:$0xff]  }
  0x6d   :  { %1475 = vmatprep.subr.bf16.mxu1 %v2872_v21  ;;  %v104_v52 = vld [vmem:[#allocation2 + $0x40] sm:$0xff]  ;;  %v2920_v56 = vld [vmem:[#allocation5 + $0x16c] ss:$16 sps:$4 sm:$0xff]   ;;  %v2918_v58 = vld [vmem:[#allocation5 + $0x168] ss:$16 sps:$4 sm:$0xff]  }
  0x6e   :  { %1306 = vmatpush1.bf16.msra.mxu0 %v2873_v23  ;;  %v2915_v53 = vld [vmem:[#allocation5 + $0x160] ss:$16 sps:$4 sm:$0xff]   ;;  %v111_v54 = vpack.c.bf16 %v104_v52, %v97_v51  ;;  %v2916_v55 = vld [vmem:[#allocation5 + $0x184] ss:$16 sps:$4 sm:$0xff]   ;;  %v2926_v60 = vld [vmem:[#allocation5 + $0x18c] ss:$16 sps:$4 sm:$0xff]  }
  0x6f   :  { %1307 = vmatprep.subr.bf16.mxu0 %v2874_v24  ;;  %v2921_v57 = vld [vmem:[#allocation5 + $0x180] ss:$16 sps:$4 sm:$0xff]   ;;  %v2922_v59 = vld [vmem:[#allocation5 + $0x1a4] ss:$16 sps:$4 sm:$0xff]   ;;  %v2924_v62 = vld [vmem:[#allocation5 + $0x188] ss:$16 sps:$4 sm:$0xff]  }
  0x70   :  { %1476 = vmatpush1.bf16.msra.mxu1 %v2870_v22  ;;  %1329 = vmatprep.mubr.bf16.mxu0 %v111_v54  ;;  %v2927_v61 = vld [vmem:[#allocation5 + $0x1a0] ss:$16 sps:$4 sm:$0xff]   ;;  %v2928_v63 = vld [vmem:[#allocation5 + $0x1c4] ss:$16 sps:$4 sm:$0xff]   ;;  %v2932_v1 = vld [vmem:[#allocation5 + $0x1ac] ss:$16 sps:$4 sm:$0xff]  }
  0x71   :  { %1477 = vmatprep.subr.bf16.mxu1 %v2878_v25  ;;  %1501 = vmatprep.mubr.bf16.mxu1 %v111_v54  ;;  %v2933_v2 = vld [vmem:[#allocation5 + $0x1c0] ss:$16 sps:$4 sm:$0xff]   ;;  %v2930_v3 = vld [vmem:[#allocation5 + $0x1a8] ss:$16 sps:$4 sm:$0xff]   ;;  %v2934_v4 = vld [vmem:[#allocation5 + $0x1e4] ss:$16 sps:$4 sm:$0xff]  }
  0x72   :  { %1308 = vmatpush1.bf16.msra.mxu0 %v2879_v26  ;;  %v2938_v5 = vld [vmem:[#allocation5 + $0x1cc] ss:$16 sps:$4 sm:$0xff]   ;;  %v2939_v6 = vld [vmem:[#allocation5 + $0x1e0] ss:$16 sps:$4 sm:$0xff]   ;;  %v2936_v9 = vld [vmem:[#allocation5 + $0x1c8] ss:$16 sps:$4 sm:$0xff]  }
  0x73   :  { %1309 = vmatprep.subr.bf16.mxu0 %v2880_v28  ;;  %v96_v7 = vld [vmem:[#allocation2] sm:$0xff]  ;;  %v103_v8 = vld [vmem:[#allocation2 + $0x38] sm:$0xff] }
  0x74   :  { %1478 = vmatpush1.bf16.msra.mxu1 %v2876_v27  ;;  %v2942_v10 = vld [vmem:[#allocation5 + $0x204] ss:$16 sps:$4 sm:$0xff]   ;;  %v2945_v12 = vld [vmem:[#allocation5 + $0x1ec] ss:$16 sps:$4 sm:$0xff]   ;;  %v110_v13 = vpack.c.bf16 %v103_v8, %v96_v7  ;;  %v2940_v14 = vld [vmem:[#allocation5 + $0x200] ss:$16 sps:$4 sm:$0xff]  }
  0x75   :  { %1479 = vmatprep.subr.bf16.mxu1 %v2884_v29  ;;  %v2943_v15 = vld [vmem:[#allocation5 + $0x1e8] ss:$16 sps:$4 sm:$0xff]   ;;  %v2948_v16 = vld [vmem:[#allocation5 + $0x224] ss:$16 sps:$4 sm:$0xff]   ;;  %v2951_v17 = vld [vmem:[#allocation5 + $0x20c] ss:$16 sps:$4 sm:$0xff]  }
  0x76   :  { %1310 = vmatpush1.bf16.msra.mxu0 %v2885_v31  ;;  %v2946_v18 = vld [vmem:[#allocation5 + $0x220] ss:$16 sps:$4 sm:$0xff]   ;;  %v2949_v19 = vld [vmem:[#allocation5 + $0x208] ss:$16 sps:$4 sm:$0xff]   ;;  %v2954_v20 = vld [vmem:[#allocation5 + $0x244] ss:$16 sps:$4 sm:$0xff]  }
  0x77   :  { %1311 = vmatprep.subr.bf16.mxu0 %v2886_v32  ;;  %v2957_v21 = vld [vmem:[#allocation5 + $0x22c] ss:$16 sps:$4 sm:$0xff]   ;;  %v2952_v22 = vld [vmem:[#allocation5 + $0x240] ss:$16 sps:$4 sm:$0xff]   ;;  %v2955_v23 = vld [vmem:[#allocation5 + $0x228] ss:$16 sps:$4 sm:$0xff]  }
  0x78   :  { %1480 = vmatpush1.bf16.msra.mxu1 %v2882_v30  ;;  %v2960_v24 = vld [vmem:[#allocation5 + $0x264] ss:$16 sps:$4 sm:$0xff]   ;;  %v2963_v25 = vld [vmem:[#allocation5 + $0x24c] ss:$16 sps:$4 sm:$0xff]   ;;  %v2958_v26 = vld [vmem:[#allocation5 + $0x260] ss:$16 sps:$4 sm:$0xff]  }
  0x79   :  { %1481 = vmatprep.subr.bf16.mxu1 %v2890_v33  ;;  %v2961_v27 = vld [vmem:[#allocation5 + $0x248] ss:$16 sps:$4 sm:$0xff]   ;;  %v2966_v28 = vld [vmem:[#allocation5 + $0x284] ss:$16 sps:$4 sm:$0xff]   ;;  %v2969_v29 = vld [vmem:[#allocation5 + $0x26c] ss:$16 sps:$4 sm:$0xff]  }
  0x7a   :  { %1312 = vmatpush1.bf16.msra.mxu0 %v2891_v34  ;;  %v2964_v30 = vld [vmem:[#allocation5 + $0x280] ss:$16 sps:$4 sm:$0xff]   ;;  %v2967_v31 = vld [vmem:[#allocation5 + $0x268] ss:$16 sps:$4 sm:$0xff]   ;;  %v2972_v32 = vld [vmem:[#allocation5 + $0x2a4] ss:$16 sps:$4 sm:$0xff]  }
  0x7b   :  { %1313 = vmatprep.subr.bf16.mxu0 %v2892_v36  ;;  %v2975_v33 = vld [vmem:[#allocation5 + $0x28c] ss:$16 sps:$4 sm:$0xff]   ;;  %v2970_v34 = vld [vmem:[#allocation5 + $0x2a0] ss:$16 sps:$4 sm:$0xff]   ;;  %v2978_v36 = vld [vmem:[#allocation5 + $0x2c4] ss:$16 sps:$4 sm:$0xff]  }
  0x7c   :  { %1482 = vmatpush1.bf16.msra.mxu1 %v2888_v35  ;;  %v2973_v35 = vld [vmem:[#allocation5 + $0x288] ss:$16 sps:$4 sm:$0xff]   ;;  %v2996_v51 = vld [vmem:[#allocation5 + $0x324] ss:$16 sps:$4 sm:$0xff]   ;;  %v2999_v52 = vld [vmem:[#allocation5 + $0x30c] ss:$16 sps:$4 sm:$0xff]  }
  0x7d   :  { %1483 = vmatprep.subr.bf16.mxu1 %v2896_v37  ;;  %v2981_v37 = vld [vmem:[#allocation5 + $0x2ac] ss:$16 sps:$4 sm:$0xff]   ;;  %v2997_v54 = vld [vmem:[#allocation5 + $0x308] ss:$16 sps:$4 sm:$0xff]   ;;  %v3026_v8 = vld [vmem:[#allocation5 + $0x3c4] ss:$16 sps:$4 sm:$0xff]  }
  0x7e   :  { %1314 = vmatpush1.bf16.msra.mxu0 %v2897_v39  ;;  %v99_v39 = vld [vmem:[#allocation2 + $0x18] sm:$0xff] }
  0x7f   :  { %1315 = vmatprep.subr.bf16.mxu0 %v2898_v40  ;;  %v106_v40 = vld [vmem:[#allocation2 + $0x50] sm:$0xff]  ;;  %v3021_v7 = vld [vmem:[#allocation5 + $0x388] ss:$16 sps:$4 sm:$0xff]  }
  0x80   :  { %1484 = vmatpush1.bf16.msra.mxu1 %v2894_v38  ;;  %v2976_v38 = vld [vmem:[#allocation5 + $0x2c0] ss:$16 sps:$4 sm:$0xff]  }
  0x81   :  { %1485 = vmatprep.subr.bf16.mxu1 %v2902_v41  ;;  %v2979_v41 = vld [vmem:[#allocation5 + $0x2a8] ss:$16 sps:$4 sm:$0xff]  }
  0x82   :  { %1316 = vmatpush1.bf16.msra.mxu0 %v2903_v42  ;;  %v113_v42 = vpack.c.bf16 %v106_v40, %v99_v39  ;;  %v3062_v39 = vld [vmem:[#allocation5 + $0x484] ss:$16 sps:$4 sm:$0xff]   ;;  %v3065_v40 = vld [vmem:[#allocation5 + $0x46c] ss:$16 sps:$4 sm:$0xff]  }
  0x83   :  { %1317 = vmatprep.subr.bf16.mxu0 %v2904_v44  ;;  %v2987_v44 = vld [vmem:[#allocation5 + $0x2cc] ss:$16 sps:$4 sm:$0xff]  }
  0x84   :  { %1486 = vmatpush1.bf16.msra.mxu1 %v2900_v43  ;;  %v2984_v43 = vld [vmem:[#allocation5 + $0x2e4] ss:$16 sps:$4 sm:$0xff]  }
  0x85   :  { %1487 = vmatprep.subr.bf16.mxu1 %v2908_v45  ;;  %v2982_v45 = vld [vmem:[#allocation5 + $0x2e0] ss:$16 sps:$4 sm:$0xff]  }
  0x86   :  { %1318 = vmatpush1.bf16.msra.mxu0 %v2909_v47  ;;  %v2990_v47 = vld [vmem:[#allocation5 + $0x304] ss:$16 sps:$4 sm:$0xff]  }
  0x87   :  { %1319 = vmatprep.subr.bf16.mxu0 %v2910_v48  ;;  %v2993_v48 = vld [vmem:[#allocation5 + $0x2ec] ss:$16 sps:$4 sm:$0xff]  }
  0x88   :  { %1488 = vmatpush1.bf16.msra.mxu1 %v2906_v46  ;;  %v2985_v46 = vld [vmem:[#allocation5 + $0x2c8] ss:$16 sps:$4 sm:$0xff]  }
  0x89   :  { %1489 = vmatprep.subr.bf16.mxu1 %v2914_v49  ;;  %v2988_v49 = vld [vmem:[#allocation5 + $0x300] ss:$16 sps:$4 sm:$0xff]  }
  0x8a   :  { %1320 = vmatpush1.bf16.msra.mxu0 %v2915_v53  ;;  %v2994_v53 = vld [vmem:[#allocation5 + $0x320] ss:$16 sps:$4 sm:$0xff]  }
  0x8b   :  { %1321 = vmatprep.subr.bf16.mxu0 %v2916_v55  ;;  %v3002_v55 = vld [vmem:[#allocation5 + $0x344] ss:$16 sps:$4 sm:$0xff]  }
  0x8c   :  { %1490 = vmatpush1.bf16.msra.mxu1 %v2912_v50  ;;  %v2991_v50 = vld [vmem:[#allocation5 + $0x2e8] ss:$16 sps:$4 sm:$0xff]  }
  0x8d   :  { %1491 = vmatprep.subr.bf16.mxu1 %v2920_v56  ;;  %v3005_v56 = vld [vmem:[#allocation5 + $0x32c] ss:$16 sps:$4 sm:$0xff]  }
  0x8e   :  { %1322 = vmatpush1.bf16.msra.mxu0 %v2921_v57  ;;  %v3000_v57 = vld [vmem:[#allocation5 + $0x340] ss:$16 sps:$4 sm:$0xff]  }
  0x8f   :  { %1323 = vmatprep.subr.bf16.mxu0 %v2922_v59  ;;  %v3008_v59 = vld [vmem:[#allocation5 + $0x364] ss:$16 sps:$4 sm:$0xff]  }
  0x90   :  { %1492 = vmatpush1.bf16.msra.mxu1 %v2918_v58  ;;  %v3003_v58 = vld [vmem:[#allocation5 + $0x328] ss:$16 sps:$4 sm:$0xff]  }
  0x91   :  { %1493 = vmatprep.subr.bf16.mxu1 %v2926_v60  ;;  %v3011_v60 = vld [vmem:[#allocation5 + $0x34c] ss:$16 sps:$4 sm:$0xff]  }
  0x92   :  { %1324 = vmatpush1.bf16.msra.mxu0 %v2927_v61  ;;  %v3006_v61 = vld [vmem:[#allocation5 + $0x360] ss:$16 sps:$4 sm:$0xff]  }
  0x93   :  { %1325 = vmatprep.subr.bf16.mxu0 %v2928_v63  ;;  %v3014_v63 = vld [vmem:[#allocation5 + $0x384] ss:$16 sps:$4 sm:$0xff]  }
  0x94   :  { %1494 = vmatpush1.bf16.msra.mxu1 %v2924_v62  ;;  %v3009_v62 = vld [vmem:[#allocation5 + $0x348] ss:$16 sps:$4 sm:$0xff]  }
  0x95   :  { %1495 = vmatprep.subr.bf16.mxu1 %v2932_v1  ;;  %v3017_v1 = vld [vmem:[#allocation5 + $0x36c] ss:$16 sps:$4 sm:$0xff]  }
  0x96   :  { %1326 = vmatpush1.bf16.msra.mxu0 %v2933_v2  ;;  %v3012_v2 = vld [vmem:[#allocation5 + $0x380] ss:$16 sps:$4 sm:$0xff]  }
  0x97   :  { %1327 = vmatprep.subr.bf16.mxu0 %v2934_v4  ;;  %v3020_v4 = vld [vmem:[#allocation5 + $0x3a4] ss:$16 sps:$4 sm:$0xff]  }
  0x98   :  { %1496 = vmatpush1.bf16.msra.mxu1 %v2930_v3  ;;  %v3015_v3 = vld [vmem:[#allocation5 + $0x368] ss:$16 sps:$4 sm:$0xff]  }
  0x99   :  { %1497 = vmatprep.subr.bf16.mxu1 %v2938_v5  ;;  %v3023_v5 = vld [vmem:[#allocation5 + $0x38c] ss:$16 sps:$4 sm:$0xff]  }
  0x9a   :  { %1328 = vmatpush1.bf16.msra.mxu0 %v2939_v6  ;;  %v3018_v6 = vld [vmem:[#allocation5 + $0x3a0] ss:$16 sps:$4 sm:$0xff]  }
  0x9b   :  { %1340 = vmatprep.subr.bf16.mxu0 %v2942_v10  ;;  %v3024_v10 = vld [vmem:[#allocation5 + $0x3c0] ss:$16 sps:$4 sm:$0xff]  }
  0x9c   :  { %1498 = vmatpush1.bf16.msra.mxu1 %v2936_v9  ;;  %v3029_v9 = vld [vmem:[#allocation5 + $0x3ac] ss:$16 sps:$4 sm:$0xff]  }
  0x9d   :  { %1499 = vmatprep.subr.bf16.mxu1 %v2945_v12  ;;  %1330 = vmatmul.mubr.bf16.vlgmr.msra.gmra.mrb[0].mxu0 %v110_v13  ;;  %v3027_v12 = vld [vmem:[#allocation5 + $0x3a8] ss:$16 sps:$4 sm:$0xff]  }
  0x9e   :  { %1341 = vmatpush1.bf16.msra.mxu0 %v2940_v14  ;;  %1372 = vmatprep.mubr.bf16.mxu0 %v113_v42  ;;  %v3035_v14 = vld [vmem:[#allocation5 + $0x3cc] ss:$16 sps:$4 sm:$0xff]  }
  0x9f   :  { %1342 = vmatprep.subr.bf16.mxu0 %v2948_v16  ;;  %v98_v16 = vld [vmem:[#allocation2 + $0x10] sm:$0xff] }
  0xa0   :  { %1500 = vmatpush1.bf16.msra.mxu1 %v2943_v15  ;;  %v3030_v15 = vld [vmem:[#allocation5 + $0x3e0] ss:$16 sps:$4 sm:$0xff]  }
  0xa1   :  { %1512 = vmatprep.subr.bf16.mxu1 %v2951_v17  ;;  %v105_v17 = vld [vmem:[#allocation2 + $0x48] sm:$0xff] }
  0xa2   :  { %1343 = vmatpush1.bf16.msra.mxu0 %v2946_v18  ;;  %v3033_v18 = vld [vmem:[#allocation5 + $0x3c8] ss:$16 sps:$4 sm:$0xff]  }
  0xa3   :  { %1502 = vmatmul.mubr.bf16.vlgmr.msra.gmra.mrb[4].mxu1 %v110_v13  ;;  %1344 = vmatprep.subr.bf16.mxu0 %v2954_v20  ;;  %v3032_v13 = vld [vmem:[#allocation5 + $0x3e4] ss:$16 sps:$4 sm:$0xff]   ;;  %v3041_v20 = vld [vmem:[#allocation5 + $0x3ec] ss:$16 sps:$4 sm:$0xff]  }
  0xa4   :  { %1513 = vmatpush1.bf16.msra.mxu1 %v2949_v19  ;;  %1544 = vmatprep.mubr.bf16.mxu1 %v113_v42  ;;  %v3038_v19 = vld [vmem:[#allocation5 + $0x404] ss:$16 sps:$4 sm:$0xff]   ;;  %v3063_v42 = vld [vmem:[#allocation5 + $0x468] ss:$16 sps:$4 sm:$0xff]  }
  0xa5   :  { %1514 = vmatprep.subr.bf16.mxu1 %v2957_v21  ;;  %v112_v21 = vpack.c.bf16 %v105_v17, %v98_v16  ;;  %v3117_v16 = vld [vmem:[#allocation5 + $0x588] ss:$16 sps:$4 sm:$0xff]   ;;  %v3122_v17 = vld [vmem:[#allocation5 + $0x5c4] ss:$16 sps:$4 sm:$0xff]  }
  0xa6   :  { %1345 = vmatpush1.bf16.msra.mxu0 %v2952_v22  ;;  %v3036_v22 = vld [vmem:[#allocation5 + $0x400] ss:$16 sps:$4 sm:$0xff]  }
  0xa7   :  { %1346 = vmatprep.subr.bf16.mxu0 %v2960_v24  ;;  %v3044_v24 = vld [vmem:[#allocation5 + $0x424] ss:$16 sps:$4 sm:$0xff]  }
  0xa8   :  { %1515 = vmatpush1.bf16.msra.mxu1 %v2955_v23  ;;  %v3039_v23 = vld [vmem:[#allocation5 + $0x3e8] ss:$16 sps:$4 sm:$0xff]  }
  0xa9   :  { %1516 = vmatprep.subr.bf16.mxu1 %v2963_v25  ;;  %v3047_v25 = vld [vmem:[#allocation5 + $0x40c] ss:$16 sps:$4 sm:$0xff]  }
  0xaa   :  { %1347 = vmatpush1.bf16.msra.mxu0 %v2958_v26  ;;  %v101_v26 = vld [vmem:[#allocation2 + $0x28] sm:$0xff] }
  0xab   :  { %1348 = vmatprep.subr.bf16.mxu0 %v2966_v28  ;;  %v3042_v28 = vld [vmem:[#allocation5 + $0x420] ss:$16 sps:$4 sm:$0xff]  }
  0xac   :  { %1517 = vmatpush1.bf16.msra.mxu1 %v2961_v27  ;;  %v108_v27 = vld [vmem:[#allocation2 + $0x60] sm:$0xff] }
  0xad   :  { %1518 = vmatprep.subr.bf16.mxu1 %v2969_v29  ;;  %v115_v29 = vpack.c.bf16 %v108_v27, %v101_v26  ;;  %v3129_v26 = vld [vmem:[#allocation5 + $0x5c8] ss:$16 sps:$4 sm:$0xff]   ;;  %v3140_v27 = vld [vmem:[#allocation7 + $0x4] ss:$8 sps:$4 sm:$0xff]  }
  0xae   :  { %1349 = vmatpush1.bf16.msra.mxu0 %v2964_v30  ;;  %v3045_v30 = vld [vmem:[#allocation5 + $0x408] ss:$16 sps:$4 sm:$0xff]  }
  0xaf   :  { %1350 = vmatprep.subr.bf16.mxu0 %v2972_v32  ;;  %v3053_v32 = vld [vmem:[#allocation5 + $0x42c] ss:$16 sps:$4 sm:$0xff]  }
  0xb0   :  { %1519 = vmatpush1.bf16.msra.mxu1 %v2967_v31  ;;  %v3050_v31 = vld [vmem:[#allocation5 + $0x444] ss:$16 sps:$4 sm:$0xff]  }
  0xb1   :  { %1520 = vmatprep.subr.bf16.mxu1 %v2975_v33  ;;  %v3048_v33 = vld [vmem:[#allocation5 + $0x440] ss:$16 sps:$4 sm:$0xff]  }
  0xb2   :  { %1351 = vmatpush1.bf16.msra.mxu0 %v2970_v34  ;;  %v3051_v34 = vld [vmem:[#allocation5 + $0x428] ss:$16 sps:$4 sm:$0xff]  }
  0xb3   :  { %1352 = vmatprep.subr.bf16.mxu0 %v2978_v36  ;;  %v3059_v36 = vld [vmem:[#allocation5 + $0x44c] ss:$16 sps:$4 sm:$0xff]  }
  0xb4   :  { %1521 = vmatpush1.bf16.msra.mxu1 %v2973_v35  ;;  %v3056_v35 = vld [vmem:[#allocation5 + $0x464] ss:$16 sps:$4 sm:$0xff]  }
  0xb5   :  { %1522 = vmatprep.subr.bf16.mxu1 %v2981_v37  ;;  %v3054_v37 = vld [vmem:[#allocation5 + $0x460] ss:$16 sps:$4 sm:$0xff]  }
  0xb6   :  { %1353 = vmatpush1.bf16.msra.mxu0 %v2976_v38  ;;  %v3057_v38 = vld [vmem:[#allocation5 + $0x448] ss:$16 sps:$4 sm:$0xff]  }
  0xb7   :  { %1354 = vmatprep.subr.bf16.mxu0 %v2984_v43  ;;  %v3068_v43 = vld [vmem:[#allocation5 + $0x4a4] ss:$16 sps:$4 sm:$0xff]  }
  0xb8   :  { %1523 = vmatpush1.bf16.msra.mxu1 %v2979_v41  ;;  %v3060_v41 = vld [vmem:[#allocation5 + $0x480] ss:$16 sps:$4 sm:$0xff]  }
  0xb9   :  { %1524 = vmatprep.subr.bf16.mxu1 %v2987_v44  ;;  %v3071_v44 = vld [vmem:[#allocation5 + $0x48c] ss:$16 sps:$4 sm:$0xff]  }
  0xba   :  { %1355 = vmatpush1.bf16.msra.mxu0 %v2982_v45  ;;  %v3066_v45 = vld [vmem:[#allocation5 + $0x4a0] ss:$16 sps:$4 sm:$0xff]  }
  0xbb   :  { %1356 = vmatprep.subr.bf16.mxu0 %v2990_v47  ;;  %v3074_v47 = vld [vmem:[#allocation5 + $0x4c4] ss:$16 sps:$4 sm:$0xff]  }
  0xbc   :  { %1525 = vmatpush1.bf16.msra.mxu1 %v2985_v46  ;;  %v3069_v46 = vld [vmem:[#allocation5 + $0x488] ss:$16 sps:$4 sm:$0xff]  }
  0xbd   :  { %1526 = vmatprep.subr.bf16.mxu1 %v2993_v48  ;;  %v3077_v48 = vld [vmem:[#allocation5 + $0x4ac] ss:$16 sps:$4 sm:$0xff]  }
  0xbe   :  { %1357 = vmatpush1.bf16.msra.mxu0 %v2988_v49  ;;  %v3072_v49 = vld [vmem:[#allocation5 + $0x4c0] ss:$16 sps:$4 sm:$0xff]  }
  0xbf   :  { %1358 = vmatprep.subr.bf16.mxu0 %v2996_v51  ;;  %v3080_v51 = vld [vmem:[#allocation5 + $0x4e4] ss:$16 sps:$4 sm:$0xff]  }
  0xc0   :  { %1527 = vmatpush1.bf16.msra.mxu1 %v2991_v50  ;;  %v3075_v50 = vld [vmem:[#allocation5 + $0x4a8] ss:$16 sps:$4 sm:$0xff]  }
  0xc1   :  { %1528 = vmatprep.subr.bf16.mxu1 %v2999_v52  ;;  %v3083_v52 = vld [vmem:[#allocation5 + $0x4cc] ss:$16 sps:$4 sm:$0xff]  }
  0xc2   :  { %1359 = vmatpush1.bf16.msra.mxu0 %v2994_v53  ;;  %v3078_v53 = vld [vmem:[#allocation5 + $0x4e0] ss:$16 sps:$4 sm:$0xff]  }
  0xc3   :  { %1360 = vmatprep.subr.bf16.mxu0 %v3002_v55  ;;  %v3086_v55 = vld [vmem:[#allocation5 + $0x504] ss:$16 sps:$4 sm:$0xff]  }
  0xc4   :  { %1529 = vmatpush1.bf16.msra.mxu1 %v2997_v54  ;;  %v3081_v54 = vld [vmem:[#allocation5 + $0x4c8] ss:$16 sps:$4 sm:$0xff]  }
  0xc5   :  { %1530 = vmatprep.subr.bf16.mxu1 %v3005_v56  ;;  %v3089_v56 = vld [vmem:[#allocation5 + $0x4ec] ss:$16 sps:$4 sm:$0xff]  }
  0xc6   :  { %1361 = vmatpush1.bf16.msra.mxu0 %v3000_v57  ;;  %v3084_v57 = vld [vmem:[#allocation5 + $0x500] ss:$16 sps:$4 sm:$0xff]  }
  0xc7   :  { %1362 = vmatprep.subr.bf16.mxu0 %v3008_v59  ;;  %v3092_v59 = vld [vmem:[#allocation5 + $0x524] ss:$16 sps:$4 sm:$0xff]  }
  0xc8   :  { %1531 = vmatpush1.bf16.msra.mxu1 %v3003_v58  ;;  %v3087_v58 = vld [vmem:[#allocation5 + $0x4e8] ss:$16 sps:$4 sm:$0xff]  }
  0xc9   :  { %1532 = vmatprep.subr.bf16.mxu1 %v3011_v60  ;;  %v3095_v60 = vld [vmem:[#allocation5 + $0x50c] ss:$16 sps:$4 sm:$0xff]  }
  0xca   :  { %1363 = vmatpush1.bf16.msra.mxu0 %v3006_v61  ;;  %v3090_v61 = vld [vmem:[#allocation5 + $0x520] ss:$16 sps:$4 sm:$0xff]  }
  0xcb   :  { %1364 = vmatprep.subr.bf16.mxu0 %v3014_v63  ;;  %v3098_v63 = vld [vmem:[#allocation5 + $0x544] ss:$16 sps:$4 sm:$0xff]  }
  0xcc   :  { %1533 = vmatpush1.bf16.msra.mxu1 %v3009_v62  ;;  %v3093_v62 = vld [vmem:[#allocation5 + $0x508] ss:$16 sps:$4 sm:$0xff]  }
  0xcd   :  { %1534 = vmatprep.subr.bf16.mxu1 %v3017_v1  ;;  %v3101_v1 = vld [vmem:[#allocation5 + $0x52c] ss:$16 sps:$4 sm:$0xff]  }
  0xce   :  { %1365 = vmatpush1.bf16.msra.mxu0 %v3012_v2  ;;  %v3096_v2 = vld [vmem:[#allocation5 + $0x540] ss:$16 sps:$4 sm:$0xff]  }
  0xcf   :  { %1366 = vmatprep.subr.bf16.mxu0 %v3020_v4  ;;  %v3104_v4 = vld [vmem:[#allocation5 + $0x564] ss:$16 sps:$4 sm:$0xff]  }
  0xd0   :  { %1535 = vmatpush1.bf16.msra.mxu1 %v3015_v3  ;;  %v3099_v3 = vld [vmem:[#allocation5 + $0x528] ss:$16 sps:$4 sm:$0xff]  }
  0xd1   :  { %1536 = vmatprep.subr.bf16.mxu1 %v3023_v5  ;;  %v3107_v5 = vld [vmem:[#allocation5 + $0x54c] ss:$16 sps:$4 sm:$0xff]  }
  0xd2   :  { %1367 = vmatpush1.bf16.msra.mxu0 %v3018_v6  ;;  %v3102_v6 = vld [vmem:[#allocation5 + $0x560] ss:$16 sps:$4 sm:$0xff]  }
  0xd3   :  { %1368 = vmatprep.subr.bf16.mxu0 %v3026_v8  ;;  %v3110_v8 = vld [vmem:[#allocation5 + $0x584] ss:$16 sps:$4 sm:$0xff]  }
  0xd4   :  { %1537 = vmatpush1.bf16.msra.mxu1 %v3021_v7  ;;  %v3105_v7 = vld [vmem:[#allocation5 + $0x548] ss:$16 sps:$4 sm:$0xff]  }
  0xd5   :  { %1538 = vmatprep.subr.bf16.mxu1 %v3029_v9  ;;  %v3113_v9 = vld [vmem:[#allocation5 + $0x56c] ss:$16 sps:$4 sm:$0xff]  }
  0xd6   :  { %1369 = vmatpush1.bf16.msra.mxu0 %v3024_v10  ;;  %v3108_v10 = vld [vmem:[#allocation5 + $0x580] ss:$16 sps:$4 sm:$0xff]  }
  0xd7   :  { %1370 = vmatprep.subr.bf16.mxu0 %v3032_v13  ;;  %v3116_v13 = vld [vmem:[#allocation5 + $0x5a4] ss:$16 sps:$4 sm:$0xff]  }
  0xd8   :  { %1539 = vmatpush1.bf16.msra.mxu1 %v3027_v12  ;;  %v3111_v12 = vld [vmem:[#allocation5 + $0x568] ss:$16 sps:$4 sm:$0xff]  }
  0xd9   :  { %1540 = vmatprep.subr.bf16.mxu1 %v3035_v14  ;;  %v3119_v14 = vld [vmem:[#allocation5 + $0x58c] ss:$16 sps:$4 sm:$0xff]  }
  0xda   :  { %1371 = vmatpush1.bf16.msra.mxu0 %v3030_v15  ;;  %v3114_v15 = vld [vmem:[#allocation5 + $0x5a0] ss:$16 sps:$4 sm:$0xff]  }
  0xdb   :  { %1383 = vmatprep.subr.bf16.mxu0 %v3038_v19  ;;  %v3120_v19 = vld [vmem:[#allocation5 + $0x5c0] ss:$16 sps:$4 sm:$0xff]  }
  0xdc   :  { %1541 = vmatpush1.bf16.msra.mxu1 %v3033_v18  ;;  %v3125_v18 = vld [vmem:[#allocation5 + $0x5ac] ss:$16 sps:$4 sm:$0xff]  }
  0xdd   :  { %1542 = vmatprep.subr.bf16.mxu1 %v3041_v20  ;;  %1373 = vmatmul.mubr.bf16.vlgmr.msra.gmra.mrb[0].mxu0 %v112_v21  ;;  %v3123_v20 = vld [vmem:[#allocation5 + $0x5a8] ss:$16 sps:$4 sm:$0xff]  }
  0xde   :  { %1384 = vmatpush1.bf16.msra.mxu0 %v3036_v22  ;;  %1415 = vmatprep.mubr.bf16.mxu0 %v115_v29  ;;  %v3131_v22 = vld [vmem:[#allocation5 + $0x5cc] ss:$16 sps:$4 sm:$0xff]  }
  0xdf   :  { %1385 = vmatprep.subr.bf16.mxu0 %v3044_v24  ;;  %v100_v24 = vld [vmem:[#allocation2 + $0x20] sm:$0xff] }
  0xe0   :  { %1543 = vmatpush1.bf16.msra.mxu1 %v3039_v23  ;;  %v3126_v23 = vld [vmem:[#allocation5 + $0x5e0] ss:$16 sps:$4 sm:$0xff]  }
  0xe1   :  { %1555 = vmatprep.subr.bf16.mxu1 %v3047_v25  ;;  %v107_v25 = vld [vmem:[#allocation2 + $0x58] sm:$0xff] }
  0xe2   :  { %1386 = vmatpush1.bf16.msra.mxu0 %v3042_v28  ;;  %v3134_v28 = vld [vmem:[#allocation5 + $0x5ec] ss:$16 sps:$4 sm:$0xff]  }
  0xe3   :  { %1545 = vmatmul.mubr.bf16.vlgmr.msra.gmra.mrb[4].mxu1 %v112_v21  ;;  %1387 = vmatprep.subr.bf16.mxu0 %v3050_v31  ;;  %v3128_v21 = vld [vmem:[#allocation5 + $0x5e4] ss:$16 sps:$4 sm:$0xff]   ;;  %v3132_v31 = vld [vmem:[#allocation5 + $0x5e8] ss:$16 sps:$4 sm:$0xff]  }
  0xe4   :  { %1556 = vmatpush1.bf16.msra.mxu1 %v3045_v30  ;;  %1587 = vmatprep.mubr.bf16.mxu1 %v115_v29  ;;  %v114_v29 = vpack.c.bf16 %v107_v25, %v100_v24  ;;  %v3138_v30 = vld [vmem:[#allocation7] ss:$8 sps:$4 sm:$0xff]  }
  0xe5   :  { %1557 = vmatprep.subr.bf16.mxu1 %v3053_v32  ;;  %v3143_v32 = vld [vmem:[#allocation7 + $0x14] ss:$8 sps:$4 sm:$0xff]  }
  0xe6   :  { %1388 = vmatpush1.bf16.msra.mxu0 %v3048_v33  ;;  %v3137_v33 = vld [vmem:[#allocation5 + $0x60c] ss:$16 sps:$4 sm:$0xff]  }
  0xe7   :  { %1389 = vmatprep.subr.bf16.mxu0 %v3056_v35  ;;  %v3135_v35 = vld [vmem:[#allocation5 + $0x608] ss:$16 sps:$4 sm:$0xff]  }
  0xe8   :  { %1558 = vmatpush1.bf16.msra.mxu1 %v3051_v34  ;;  %v3141_v34 = vld [vmem:[#allocation7 + $0x10] ss:$8 sps:$4 sm:$0xff]  }
  0xe9   :  { %1559 = vmatprep.subr.bf16.mxu1 %v3059_v36  ;;  %v3146_v36 = vld [vmem:[#allocation7 + $0x24] ss:$8 sps:$4 sm:$0xff]  }
  0xea   :  { %1390 = vmatpush1.bf16.msra.mxu0 %v3054_v37  ;;  %v3144_v37 = vld [vmem:[#allocation7 + $0x20] ss:$8 sps:$4 sm:$0xff]  }
  0xeb   :  { %1391 = vmatprep.subr.bf16.mxu0 %v3062_v39  ;;  %v3147_v39 = vld [vmem:[#allocation7 + $0x30] ss:$8 sps:$4 sm:$0xff]  }
  0xec   :  { %1560 = vmatpush1.bf16.msra.mxu1 %v3057_v38  ;;  %v3149_v38 = vld [vmem:[#allocation7 + $0x34] ss:$8 sps:$4 sm:$0xff]  }
  0xed   :  { %1561 = vmatprep.subr.bf16.mxu1 %v3065_v40  ;;  %v3152_v40 = vld [vmem:[#allocation7 + $0x44] ss:$8 sps:$4 sm:$0xff]  }
  0xee   :  { %1392 = vmatpush1.bf16.msra.mxu0 %v3060_v41  ;;  %v3150_v41 = vld [vmem:[#allocation7 + $0x40] ss:$8 sps:$4 sm:$0xff]  }
  0xef   :  { %1393 = vmatprep.subr.bf16.mxu0 %v3068_v43  ;;  %v3153_v43 = vld [vmem:[#allocation7 + $0x50] ss:$8 sps:$4 sm:$0xff]  }
  0xf0   :  { %1562 = vmatpush1.bf16.msra.mxu1 %v3063_v42  ;;  %v3155_v42 = vld [vmem:[#allocation7 + $0x54] ss:$8 sps:$4 sm:$0xff]  }
  0xf1   :  { %1563 = vmatprep.subr.bf16.mxu1 %v3071_v44  ;;  %v3158_v44 = vld [vmem:[#allocation7 + $0x64] ss:$8 sps:$4 sm:$0xff]  }
  0xf2   :  { %1394 = vmatpush1.bf16.msra.mxu0 %v3066_v45  ;;  %v3156_v45 = vld [vmem:[#allocation7 + $0x60] ss:$8 sps:$4 sm:$0xff]  }
  0xf3   :  { %1395 = vmatprep.subr.bf16.mxu0 %v3074_v47 }
  0xf4   :  { %1564 = vmatpush1.bf16.msra.mxu1 %v3069_v46 }
  0xf5   :  { %1565 = vmatprep.subr.bf16.mxu1 %v3077_v48  ;;  %v3159_v48 = vld [vmem:[#allocation7 + $0x70] ss:$8 sps:$4 sm:$0xff]  }
  0xf6   :  { %1396 = vmatpush1.bf16.msra.mxu0 %v3072_v49 }
  0xf7   :  { %1397 = vmatprep.subr.bf16.mxu0 %v3080_v51 }
  0xf8   :  { %1566 = vmatpush1.bf16.msra.mxu1 %v3075_v50  ;;  %v3164_v50 = vld [vmem:[#allocation7 + $0x84] ss:$8 sps:$4 sm:$0xff]  }
  0xf9   :  { %1567 = vmatprep.subr.bf16.mxu1 %v3083_v52  ;;  %v3167_v52 = vld [vmem:[#allocation7 + $0x94] ss:$8 sps:$4 sm:$0xff]  }
  0xfa   :  { %1398 = vmatpush1.bf16.msra.mxu0 %v3078_v53  ;;  %v3165_v53 = vld [vmem:[#allocation7 + $0x90] ss:$8 sps:$4 sm:$0xff]  }
  0xfb   :  { %1399 = vmatprep.subr.bf16.mxu0 %v3086_v55  ;;  %v3168_v55 = vld [vmem:[#allocation7 + $0xa0] ss:$8 sps:$4 sm:$0xff]  }
  0xfc   :  { %1568 = vmatpush1.bf16.msra.mxu1 %v3081_v54  ;;  %v3170_v54 = vld [vmem:[#allocation7 + $0xa4] ss:$8 sps:$4 sm:$0xff]  }
  0xfd   :  { %1569 = vmatprep.subr.bf16.mxu1 %v3089_v56  ;;  %v3173_v56 = vld [vmem:[#allocation7 + $0xb4] ss:$8 sps:$4 sm:$0xff]  }
  0xfe   :  { %1400 = vmatpush1.bf16.msra.mxu0 %v3084_v57  ;;  %v3171_v57 = vld [vmem:[#allocation7 + $0xb0] ss:$8 sps:$4 sm:$0xff]  }
  0xff   :  { %1401 = vmatprep.subr.bf16.mxu0 %v3092_v59  ;;  %v3174_v59 = vld [vmem:[#allocation7 + $0xc0] ss:$8 sps:$4 sm:$0xff]  }
 0x100   :  { %1570 = vmatpush1.bf16.msra.mxu1 %v3087_v58  ;;  %v3176_v58 = vld [vmem:[#allocation7 + $0xc4] ss:$8 sps:$4 sm:$0xff]  }
 0x101   :  { %1571 = vmatprep.subr.bf16.mxu1 %v3095_v60  ;;  %v3179_v60 = vld [vmem:[#allocation7 + $0xd4] ss:$8 sps:$4 sm:$0xff]  }
 0x102   :  { %1402 = vmatpush1.bf16.msra.mxu0 %v3090_v61  ;;  %v3177_v61 = vld [vmem:[#allocation7 + $0xd0] ss:$8 sps:$4 sm:$0xff]  }
 0x103   :  { %1403 = vmatprep.subr.bf16.mxu0 %v3098_v63  ;;  %v3180_v63 = vld [vmem:[#allocation7 + $0xe0] ss:$8 sps:$4 sm:$0xff]  }
 0x104   :  { %1572 = vmatpush1.bf16.msra.mxu1 %v3093_v62  ;;  %v3182_v62 = vld [vmem:[#allocation7 + $0xe4] ss:$8 sps:$4 sm:$0xff]  }
 0x105   :  { %1573 = vmatprep.subr.bf16.mxu1 %v3101_v1  ;;  %v3185_v1 = vld [vmem:[#allocation7 + $0xf4] ss:$8 sps:$4 sm:$0xff]  }
 0x106   :  { %1404 = vmatpush1.bf16.msra.mxu0 %v3096_v2  ;;  %v3183_v2 = vld [vmem:[#allocation7 + $0xf0] ss:$8 sps:$4 sm:$0xff]  }
 0x107   :  { %1405 = vmatprep.subr.bf16.mxu0 %v3104_v4  ;;  %v3234_v4 = vld [vmem:[#allocation8 + $0x40] sm:$0xff]  }
 0x108   :  { %1574 = vmatpush1.bf16.msra.mxu1 %v3099_v3  ;;  %v3188_v3 = vld [vmem:[#allocation7 + $0x104] ss:$8 sps:$4 sm:$0xff]  }
 0x109   :  { %1575 = vmatprep.subr.bf16.mxu1 %v3107_v5  ;;  %v3235_v5 = vld [vmem:[#allocation8] sm:$0xff]  }
 0x10a   :  { %1406 = vmatpush1.bf16.msra.mxu0 %v3102_v6  ;;  %v3236_v6 = vld [vmem:[#allocation8 + $0x48] sm:$0xff]  }
 0x10b   :  { %1407 = vmatprep.subr.bf16.mxu0 %v3110_v8  ;;  %v3238_v8 = vld [vmem:[#allocation8 + $0x50] sm:$0xff]  }
 0x10c   :  { %1576 = vmatpush1.bf16.msra.mxu1 %v3105_v7  ;;  %v3237_v7 = vld [vmem:[#allocation8 + $0x8] sm:$0xff]  }
 0x10d   :  { %1577 = vmatprep.subr.bf16.mxu1 %v3113_v9  ;;  %v3239_v9 = vld [vmem:[#allocation8 + $0x10] sm:$0xff]  }
 0x10e   :  { %1408 = vmatpush1.bf16.msra.mxu0 %v3108_v10  ;;  %v3240_v10 = vld [vmem:[#allocation8 + $0x58] sm:$0xff]  }
 0x10f   :  { %1409 = vmatprep.subr.bf16.mxu0 %v3116_v13  ;;  %v3242_v13 = vld [vmem:[#allocation8 + $0x60] sm:$0xff]  }
 0x110   :  { %1578 = vmatpush1.bf16.msra.mxu1 %v3111_v12  ;;  %v3241_v12 = vld [vmem:[#allocation8 + $0x18] sm:$0xff]  }
 0x111   :  { %1579 = vmatprep.subr.bf16.mxu1 %v3119_v14  ;;  %v3243_v14 = vld [vmem:[#allocation8 + $0x20] sm:$0xff]  }
 0x112   :  { %1410 = vmatpush1.bf16.msra.mxu0 %v3114_v15  ;;  %v3244_v15 = vld [vmem:[#allocation8 + $0x68] sm:$0xff]  }
 0x113   :  { %1411 = vmatprep.subr.bf16.mxu0 %v3122_v17 }
 0x114   :  { %1580 = vmatpush1.bf16.msra.mxu1 %v3117_v16  ;;  %v3245_v16 = vld [vmem:[#allocation8 + $0x28] sm:$0xff]  }
 0x115   :  { %1581 = vmatprep.subr.bf16.mxu1 %v3125_v18 }
 0x116   :  { %1412 = vmatpush1.bf16.msra.mxu0 %v3120_v19 }
 0x117   :  { %1413 = vmatprep.subr.bf16.mxu0 %v3128_v21 }
 0x118   :  { %1582 = vmatpush1.bf16.msra.mxu1 %v3123_v20 }
 0x119   :  { %1583 = vmatprep.subr.bf16.mxu1 %v3131_v22 }
 0x11a   :  { %1414 = vmatpush1.bf16.msra.mxu0 %v3126_v23 }
 0x11b   :  { %2037 = vmatprep.subr.bf16.mxu0 %v3140_v27 }
 0x11c   :  { %1584 = vmatpush1.bf16.msra.mxu1 %v3129_v26 }
 0x11d   :  { %1585 = vmatprep.subr.bf16.mxu1 %v3134_v28  ;;  %1416 = vmatmul.mubr.bf16.vlgmr.msra.gmra.mrb[0].mxu0 %v114_v29 }
 0x11e   :  { %2038 = vmatpush1.bf16.msra.mxu0 %v3138_v30 }
 0x11f   :  { %2039 = vmatprep.subr.bf16.mxu0 %v3143_v32  ;;  %v3191_v32 = vld [vmem:[#allocation7 + $0x114] ss:$8 sps:$4 sm:$0xff]  }
 0x120   :  { %1586 = vmatpush1.bf16.msra.mxu1 %v3132_v31  ;;  %v3186_v31 = vld [vmem:[#allocation7 + $0x100] ss:$8 sps:$4 sm:$0xff]  }
 0x121   :  { %1598 = vmatprep.subr.bf16.mxu1 %v3137_v33  ;;  %v3189_v33 = vld [vmem:[#allocation7 + $0x110] ss:$8 sps:$4 sm:$0xff]  }
 0x122   :  { %2040 = vmatpush1.bf16.msra.mxu0 %v3141_v34  ;;  %v3194_v34 = vld [vmem:[#allocation7 + $0x124] ss:$8 sps:$4 sm:$0xff]  }
 0x123   :  { %1588 = vmatmul.mubr.bf16.vlgmr.msra.gmra.mrb[4].mxu1 %v114_v29  ;;  %2041 = vmatprep.subr.bf16.mxu0 %v3146_v36 }
 0x124   :  { %1599 = vmatpush1.bf16.msra.mxu1 %v3135_v35  ;;  %1630 = vmatprep.mubr.bf16.mxu1 %v3411_v0  ;;  %v3161_v0 = vld [vmem:[#allocation7 + $0x74] ss:$8 sps:$4 sm:$0xff]   ;;  %v3192_v35 = vld [vmem:[#allocation7 + $0x120] ss:$8 sps:$4 sm:$0xff]  }
 0x125   :  { %2748 = vmatprep.subr.bf16.mxu1 %v3234_v4  ;;  %v3228_v4 = vld [vmem:[#allocation7 + $0x1e0] ss:$8 sps:$4 sm:$0xff]  }
 0x126   :  { %2042 = vmatpush1.bf16.msra.mxu0 %v3144_v37  ;;  %v3197_v37 = vld [vmem:[#allocation7 + $0x134] ss:$8 sps:$4 sm:$0xff]  }
 0x127   :  { %2043 = vmatprep.subr.bf16.mxu0 %v3149_v38 }
 0x12a   :  { %2044 = vmatpush1.bf16.msra.mxu0 %v3147_v39 }
 0x12b   :  { %2045 = vmatprep.subr.bf16.mxu0 %v3152_v40 }
 0x12e   :  { %2046 = vmatpush1.bf16.msra.mxu0 %v3150_v41 }
 0x12f   :  { %2648 = vmatmul.mubr.msk.bf16.vlgmr.msra.gmra.mrb[4].mxu1 %vm1293_vm0, %v3522_v11  ;;  %2047 = vmatprep.subr.bf16.mxu0 %v3155_v42  ;;  %v3162_v11 = vld [vmem:[#allocation7 + $0x80] ss:$8 sps:$4 sm:$0xff]  }
 0x130   :  { %2749 = vmatpush3.bf16.msra.mxu1 %v3235_v5  ;;  %v3233_v5 = vld [vmem:[#allocation7 + $0x1f4] ss:$8 sps:$4 sm:$0xff]  }
 0x131   :  { %2750 = vmatprep.subr.bf16.mxu1 %v3236_v6  ;;  %v3231_v6 = vld [vmem:[#allocation7 + $0x1f0] ss:$8 sps:$4 sm:$0xff]  }
 0x132   :  { %2048 = vmatpush1.bf16.msra.mxu0 %v3153_v43  ;;  %v3195_v43 = vld [vmem:[#allocation7 + $0x130] ss:$8 sps:$4 sm:$0xff]  }
 0x133   :  { %2049 = vmatprep.subr.bf16.mxu0 %v3158_v44 }
 0x134   :  { %2751 = vmatpush3.bf16.msra.mxu1 %v3237_v7  ;;  %v3246_v7 = vld [vmem:[#allocation8 + $0x70] sm:$0xff]  }
 0x135   :  { %2752 = vmatprep.subr.bf16.mxu1 %v3238_v8  ;;  %v3247_v8 = vld [vmem:[#allocation8 + $0x30] sm:$0xff]  }
 0x136   :  { %v3529_v46 = vpop.f32.mrb[0].mxu1  ;;  %2050 = vmatpush1.bf16.msra.mxu0 %v3156_v45 }
 0x137   :  { %v3531_v47 = vpop.f32.mrb[1].mxu1  ;;  %2051 = vmatprep.subr.bf16.mxu0 %v3161_v0  ;;  %v3200_v0 = vld [vmem:[#allocation7 + $0x144] ss:$8 sps:$4 sm:$0xff]  }
 0x138   :  { %v3533_v49 = vpop.f32.mrb[2].mxu1  ;;  %2753 = vmatpush3.bf16.msra.mxu1 %v3239_v9  ;;  %v3248_v9 = vld [vmem:[#allocation8 + $0x78] sm:$0xff]  }
 0x139   :  { %v3535_v51 = vpop.f32.mrb[3].mxu1  ;;  %2754 = vmatprep.subr.bf16.mxu1 %v3240_v10  ;;  %v3249_v10 = vld [vmem:[#allocation8 + $0x38] sm:$0xff]  }
 0x13a   :  { %2052 = vmatpush1.bf16.msra.mxu0 %v3159_v48  ;;  %v3198_v48 = vld [vmem:[#allocation7 + $0x140] ss:$8 sps:$4 sm:$0xff]  }
 0x13b   :  { %2053 = vmatprep.subr.bf16.mxu0 %v3164_v50  ;;  %v3201_v50 = vld [vmem:[#allocation7 + $0x150] ss:$8 sps:$4 sm:$0xff]  }
 0x13c   :  { %2755 = vmatpush3.bf16.msra.mxu1 %v3241_v12  ;;  %v3412_v12 = vmov 0.0  }
 0x13d   :  { %2756 = vmatprep.subr.bf16.mxu1 %v3242_v13 }
 0x13e   :  { %2054 = vmatpush1.bf16.msra.mxu0 %v3162_v11  ;;  %v3204_v11 = vld [vmem:[#allocation7 + $0x160] ss:$8 sps:$4 sm:$0xff]  }
 0x13f   :  { %2055 = vmatprep.subr.bf16.mxu0 %v3167_v52  ;;  %v3209_v52 = vld [vmem:[#allocation7 + $0x174] ss:$8 sps:$4 sm:$0xff]  }
 0x140   :  { %2757 = vmatpush3.bf16.msra.mxu1 %v3243_v14 }
 0x141   :  { %2758 = vmatprep.subr.bf16.mxu1 %v3244_v15 }
 0x142   :  { %2056 = vmatpush1.bf16.msra.mxu0 %v3165_v53  ;;  %v3207_v53 = vld [vmem:[#allocation7 + $0x170] ss:$8 sps:$4 sm:$0xff]  }
 0x143   :  { %2057 = vmatprep.subr.bf16.mxu0 %v3170_v54  ;;  %v3212_v54 = vld [vmem:[#allocation7 + $0x184] ss:$8 sps:$4 sm:$0xff]  }
 0x144   :  { %2759 = vmatpush3.bf16.msra.mxu1 %v3245_v16 }
 0x145   :  { %2760 = vmatprep.subr.bf16.mxu1 %v3246_v7 }
 0x146   :  { %2058 = vmatpush1.bf16.msra.mxu0 %v3168_v55  ;;  %v3210_v55 = vld [vmem:[#allocation7 + $0x180] ss:$8 sps:$4 sm:$0xff]  }
 0x147   :  { %2059 = vmatprep.subr.bf16.mxu0 %v3173_v56  ;;  %v3215_v56 = vld [vmem:[#allocation7 + $0x194] ss:$8 sps:$4 sm:$0xff]  }
 0x148   :  { %2761 = vmatpush3.bf16.msra.mxu1 %v3247_v8 }
 0x149   :  { %2762 = vmatprep.subr.bf16.mxu1 %v3248_v9 }
 0x14a   :  { %2060 = vmatpush1.bf16.msra.mxu0 %v3171_v57  ;;  %v3213_v57 = vld [vmem:[#allocation7 + $0x190] ss:$8 sps:$4 sm:$0xff]  }
 0x14b   :  { %2061 = vmatprep.subr.bf16.mxu0 %v3176_v58  ;;  %v3218_v58 = vld [vmem:[#allocation7 + $0x1a4] ss:$8 sps:$4 sm:$0xff]  }
 0x14c   :  { %2763 = vmatpush3.bf16.msra.mxu1 %v3249_v10 }
 0x14d   :  { %2779 = vmatprep.subr.bf16.mxu1 %v3412_v12 }
 0x14e   :  { %2062 = vmatpush1.bf16.msra.mxu0 %v3174_v59  ;;  %v3216_v59 = vld [vmem:[#allocation7 + $0x1a0] ss:$8 sps:$4 sm:$0xff]  }
 0x14f   :  { %2063 = vmatprep.subr.bf16.mxu0 %v3179_v60  ;;  %v3221_v60 = vld [vmem:[#allocation7 + $0x1b4] ss:$8 sps:$4 sm:$0xff]  }
 0x152   :  { %2064 = vmatpush1.bf16.msra.mxu0 %v3177_v61  ;;  %v3219_v61 = vld [vmem:[#allocation7 + $0x1b0] ss:$8 sps:$4 sm:$0xff]  }
 0x153   :  { %2065 = vmatprep.subr.bf16.mxu0 %v3182_v62  ;;  %v3224_v62 = vld [vmem:[#allocation7 + $0x1c4] ss:$8 sps:$4 sm:$0xff]  }
 0x156   :  { %2066 = vmatpush1.bf16.msra.mxu0 %v3180_v63  ;;  %v3222_v63 = vld [vmem:[#allocation7 + $0x1c0] ss:$8 sps:$4 sm:$0xff]  }
 0x157   :  { %2067 = vmatprep.subr.bf16.mxu0 %v3185_v1  ;;  %v3227_v1 = vld [vmem:[#allocation7 + $0x1d4] ss:$8 sps:$4 sm:$0xff]  }
 0x15a   :  { %2068 = vmatpush1.bf16.msra.mxu0 %v3183_v2  ;;  %v3225_v2 = vld [vmem:[#allocation7 + $0x1d0] ss:$8 sps:$4 sm:$0xff]  }
 0x15b   :  { %2080 = vmatprep.subr.bf16.mxu0 %v3188_v3  ;;  %v3230_v3 = vld [vmem:[#allocation7 + $0x1e4] ss:$8 sps:$4 sm:$0xff]  }
 0x1f0   :  { %v1417_v17 = vpop.f32.mrb[0].mxu0 }
 0x1f1   :  { %v2799_v18 = vadd.f32 %v3529_v46, %v1417_v17  ;;  %v1419_v19 = vpop.f32.mrb[1].mxu0 }
 0x1f2   :  { %v2800_v20 = vadd.f32 %v3531_v47, %v1419_v19  ;;  %v1421_v21 = vpop.f32.mrb[2].mxu0 }
 0x1f3   :  { %v2801_v22 = vadd.f32 %v3533_v49, %v1421_v21  ;;  %v1423_v23 = vpop.f32.mrb[3].mxu0  ;;  %v1641_v25 = vmax.f32 %v2799_v18, 0.0  ;;  %v3203_v49 = vld [vmem:[#allocation7 + $0x154] ss:$8 sps:$4 sm:$0xff]  }
 0x1f4   :  { %v2802_v24 = vadd.f32 %v3535_v51, %v1423_v23  ;;  %v1642_v27 = vmax.f32 %v2800_v20, 0.0  ;;  %v3206_v51 = vld [vmem:[#allocation7 + $0x164] ss:$8 sps:$4 sm:$0xff]  }
 0x1f5   :  { %v1645_v26 = vmax.f32 %v2801_v22, 0.0  ;;  %v3250_v23 = vld [vmem:[#allocation10] sm:$0xff]  }
 0x1f6   :  { %v1646_v28 = vmax.f32 %v2802_v24, 0.0  ;;  %v3251_v24 = vld [vmem:[#allocation10 + $0x8] sm:$0xff]  }
 0x1f7   :  { %v1649_v29 = vpack.c.bf16 %v1645_v26, %v1641_v25  ;;  %v3252_v25 = vld [vmem:[#allocation10 + $0x10] sm:$0xff]   ;;  %v3253_v26 = vld [vmem:[#allocation10 + $0x18] sm:$0xff]  }
 0x1f8   :  { %v1650_v30 = vpack.c.bf16 %v1646_v28, %v1642_v27  ;;  %v3254_v27 = vld [vmem:[#allocation10 + $0x20] sm:$0xff]   ;;  %v3255_v28 = vld [vmem:[#allocation10 + $0x28] sm:$0xff]  }
 0x1fa   :  { %2069 = vmatprep.mubr.bf16.mxu0 %v1650_v30  ;;  %v3257_v30 = vld [vmem:[#allocation10 + $0x38] sm:$0xff]  }
 0x1fb   :  { %2070 = vmatmul.mubr.bf16.vlgmr.msra.gmra.mrb[4].mxu0 %v1649_v29  ;;  %v3256_v29 = vld [vmem:[#allocation10 + $0x30] sm:$0xff]  }
 0x1fc   :  { %2081 = vmatpush1.bf16.msra.mxu0 %v3186_v31 }
 0x1fd   :  { %2082 = vmatprep.subr.bf16.mxu0 %v3191_v32  ;;  %v2713_v32 = vld [vmem:[%s3566_s4] ss:$0 sm:$0xff]  ;;  %s3414_s4 = smov [#allocation11]  }
 0x1fe   :  { %s2437_s22 = sshll.u32 %s3414_s4, 4  ;;  %s2438_s22 = int_to_ptr.vmem [resolvable:$true] %s2437_s22 }
 0x1ff   :  { %s3368_s23 = scalar_lea.vmem %s2438_s22, 128  ;;  %p3373_p13 = scmp.lt.s32.totalorder %s2438_s22, %s2438_s22 }
 0x200   :  { %2083 = vmatpush1.bf16.msra.mxu0 %v3189_v33  ;;  %p3369_p12 = scmp.ne.s32.totalorder %s2438_s22, %s3368_s23  ;;  %p3374_p0 = scmp.lt.s32.totalorder %s3368_s23, %s3368_s23 }
 0x201   :  { %2084 = vmatprep.subr.bf16.mxu0 %v3194_v34 }
 0x202   :  { %v1632_v36 = vpop.f32.mrb[4].mxu1  ;;  %p3375_p1 = por %p3374_p0, %p3373_p13 }
 0x203   :  { %v1634_v38 = vpop.f32.mrb[5].mxu1  ;;  %v1643_v40 = vmax.f32 %v1632_v36, 0.0 }
 0x204   :  { %v1636_v39 = vpop.f32.mrb[6].mxu1  ;;  %2085 = vmatpush1.bf16.msra.mxu0 %v3192_v35  ;;  %v1644_v44 = vmax.f32 %v1634_v38, 0.0  ;;  %p3376_p2 = pnand %p3375_p1, %p3369_p12 }
 0x205   :  { %v1647_v41 = vmax.f32 %v1636_v39, 0.0  ;;  %v1638_v42 = vpop.f32.mrb[7].mxu1  ;;  %2086 = vmatprep.subr.bf16.mxu0 %v3197_v37 }
 0x206   :  { %v1648_v45 = vmax.f32 %v1638_v42, 0.0 }
 0x207   :  { %v1651_v46 = vpack.c.bf16 %v1647_v41, %v1643_v40 }
 0x208   :  { %v1652_v47 = vpack.c.bf16 %v1648_v45, %v1644_v44  ;;  %2087 = vmatpush1.bf16.msra.mxu0 %v3195_v43  ;;  %v2730_v43 = vld [vmem:[%s3568_s6] ss:$0 sm:$0xff] }
 0x209   :  { %2088 = vmatprep.subr.bf16.mxu0 %v3200_v0 }
 0x20a   :  { %2112 = vmatprep.mubr.bf16.mxu0 %v1652_v47 }
 0x20c   :  { %2089 = vmatpush1.bf16.msra.mxu0 %v3198_v48 }
 0x20d   :  { %2090 = vmatprep.subr.bf16.mxu0 %v3203_v49 }
 0x210   :  { %2091 = vmatpush1.bf16.msra.mxu0 %v3201_v50 }
 0x211   :  { %2092 = vmatprep.subr.bf16.mxu0 %v3206_v51 }
 0x214   :  { %2093 = vmatpush1.bf16.msra.mxu0 %v3204_v11 }
 0x215   :  { %2094 = vmatprep.subr.bf16.mxu0 %v3209_v52 }
 0x218   :  { %2095 = vmatpush1.bf16.msra.mxu0 %v3207_v53 }
 0x219   :  { %2096 = vmatprep.subr.bf16.mxu0 %v3212_v54 }
 0x21c   :  { %2097 = vmatpush1.bf16.msra.mxu0 %v3210_v55 }
 0x21d   :  { %2098 = vmatprep.subr.bf16.mxu0 %v3215_v56 }
 0x220   :  { %2099 = vmatpush1.bf16.msra.mxu0 %v3213_v57 }
 0x221   :  { %2100 = vmatprep.subr.bf16.mxu0 %v3218_v58 }
 0x224   :  { %2101 = vmatpush1.bf16.msra.mxu0 %v3216_v59 }
 0x225   :  { %2102 = vmatprep.subr.bf16.mxu0 %v3221_v60 }
 0x228   :  { %2103 = vmatpush1.bf16.msra.mxu0 %v3219_v61 }
 0x229   :  { %2104 = vmatprep.subr.bf16.mxu0 %v3224_v62 }
 0x22c   :  { %2105 = vmatpush1.bf16.msra.mxu0 %v3222_v63 }
 0x22d   :  { %2106 = vmatprep.subr.bf16.mxu0 %v3227_v1 }
 0x230   :  { %2107 = vmatpush1.bf16.msra.mxu0 %v3225_v2 }
 0x231   :  { %2108 = vmatprep.subr.bf16.mxu0 %v3230_v3 }
 0x234   :  { %2109 = vmatpush1.bf16.msra.mxu0 %v3228_v4 }
 0x235   :  { %2110 = vmatprep.subr.bf16.mxu0 %v3233_v5 }
 0x238   :  { %2111 = vmatpush1.bf16.msra.mxu0 %v3231_v6 }
 0x23b   :  { %2113 = vmatmul.mubr.bf16.vlgmr.msra.gmra.mrb[4].mxu0 %v1651_v46 }
 0x30e   :  { %v2114_v13 = vpop.f32.mrb[4].mxu0 }
 0x30f   :  { %v2116_v14 = vpop.f32.mrb[5].mxu0  ;;  %v2123_v16 = vmax.f32 %v2114_v13, 0.0 }
 0x310   :  { %v2118_v15 = vpop.f32.mrb[6].mxu0  ;;  %v2124_v19 = vmax.f32 %v2116_v14, 0.0 }
 0x311   :  { %v2125_v17 = vmax.f32 %v2118_v15, 0.0  ;;  %v2120_v18 = vpop.f32.mrb[7].mxu0 }
 0x312   :  { %v2126_v20 = vmax.f32 %v2120_v18, 0.0 }
 0x313   :  { %v2127_v21 = vpack.c.bf16 %v2125_v17, %v2123_v16 }
 0x314   :  { %v2128_v22 = vpack.c.bf16 %v2126_v20, %v2124_v19 }
 0x316   :  { %2296 = vmatprep.mubr.bf16.mxu1 %v2128_v22 }
 0x317   :  { %2297 = vmatmul.mubr.bf16.vlgmr.msra.gmra.mrb[8].mxu1 %v2127_v21 }
 0x318   :  { %2780 = vmatpush3.bf16.msra.mxu1 %v3250_v23  ;;  %2795 = vmatprep.mubr.msk.bf16.mxu1 %vm3413_vm1, %v3412_v12 }
 0x319   :  { %2781 = vmatprep.subr.bf16.mxu1 %v3412_v12 }
 0x31c   :  { %2782 = vmatpush3.bf16.msra.mxu1 %v3251_v24 }
 0x31d   :  { %2783 = vmatprep.subr.bf16.mxu1 %v3412_v12 }
 0x320   :  { %2784 = vmatpush3.bf16.msra.mxu1 %v3252_v25 }
 0x321   :  { %2785 = vmatprep.subr.bf16.mxu1 %v3412_v12 }
 0x324   :  { %2786 = vmatpush3.bf16.msra.mxu1 %v3253_v26 }
 0x325   :  { %2787 = vmatprep.subr.bf16.mxu1 %v3412_v12 }
 0x328   :  { %2788 = vmatpush3.bf16.msra.mxu1 %v3254_v27 }
 0x329   :  { %2789 = vmatprep.subr.bf16.mxu1 %v3412_v12 }
 0x32c   :  { %2790 = vmatpush3.bf16.msra.mxu1 %v3255_v28 }
 0x32d   :  { %2791 = vmatprep.subr.bf16.mxu1 %v3412_v12 }
 0x330   :  { %2792 = vmatpush3.bf16.msra.mxu1 %v3256_v29 }
 0x331   :  { %2793 = vmatprep.subr.bf16.mxu1 %v3412_v12 }
 0x334   :  { %2794 = vmatpush3.bf16.msra.mxu1 %v3257_v30 }
 0x3ea   :  { %v2764_v31 = vpop.f32.mrb[8].mxu1 }
 0x3eb   :  { %v2765_v33 = vpop.f32.mrb[9].mxu1 }
 0x3ec   :  { %v2766_v34 = vadd.f32 %v2765_v33, %v2764_v31  ;;  %v2767_v35 = vpop.f32.mrb[10].mxu1 }
 0x3ed   :  { %v2768_v36 = vpop.f32.mrb[11].mxu1 }
 0x3ee   :  { %v2299_v37 = vadd.f32 %v2766_v34, %v2713_v32  ;;  %v2769_v38 = vadd.f32 %v2768_v36, %v2767_v35 }
 0x3f0   :  { %v2302_v39 = vadd.f32 %v2769_v38, %v2713_v32  ;;  %v2305_v40 = vmax.f32 %v2299_v37, 0.0 }
 0x3f2   :  { %v2306_v41 = vmax.f32 %v2302_v39, 0.0 }
 0x3f4   :  { %v2307_v42 = vpack.c.bf16 %v2306_v41, %v2305_v40 }
 0x3f6   :  { %2796 = vmatmul.mubr.bf16.vlgmr.msra.gmra.mrb[12].mxu1 %v2307_v42 }
 0x4c9   :  { %v2413_v44 = vpop.f32.mrb[12].mxu1 }
 0x4ca   :  { %v2414_v45 = vadd.f32 %v2730_v43, %v2413_v44  ;;  %v2797_v0 = vpop.f32.mrb[13].mxu1 }
 0x4cb   :  { %v2416_v46 = vpop.f32.mrb[14].mxu1 }
 0x4cc   :  { %v2417_v47 = vadd.f32 %v2730_v43, %v2416_v46  ;;  %v2798_v48 = vpop.f32.mrb[15].mxu1  ;;  %v2420_v49 = vmax.f32 %v2414_v45, 0.0 }
 0x4ce   :  { %v2421_v50 = vmax.f32 %v2417_v47, 0.0 }
 0x4d0   :  { %v2746_v51 = vpack.c.bf16 %v2421_v50, %v2420_v49 }
 0x4d2   :  { %2747 = vst [vmem:[#allocation11] sm:$0xff] %v2746_v51  }
 0x4d3   :  { %3379 = shalt.err (!%p3376_p2)
}
 0x4d4   :  { %s3380_s26 = scalar_lea.hbm %s3569_s7, 128 }
 0x4d5   :  { %p3381_p3 = scmp.ne.s32.totalorder %s3569_s7, %s3380_s26  ;;  %p3384_p4 = scmp.lt.u32.totalorder %s3380_s26, %s3569_s7 }
 0x4d7   :  { %p3386_p5 = pnand %p3384_p4, %p3381_p3 }
 0x4d9   :  { %3389 = shalt.err (!%p3386_p5)
}
 0x4da   :  { %2443 = dma.vmem_to_hbm [thread:$0]  %s2438_s22, 128, %s3569_s7, [#allocation4], %s3402_s1, %s3402_s1, %s3403_s25  }
 0x4db   :  { %3396 = dma.done.wait [#allocation4], 128  }
 0x4dc   :  { %3397 = vsyncadd [#allocation4], 4294967168 }
 0x4dd   :  { %2447 = vsyncpa [#allocation3], 1 }
 0x4de   :  { %2448 = vsyncpa [#allocation6], 1 }
 0x4df   :  { %2449 = vsyncpa [#allocation9], 1 }
 0x4e0   :  { %2450 = vsyncpa [#allocation4], 1 }

</bundles_post_ra>
